<compile_context>
chip_gen: v7x
topology: tpu7x:2x2x1
jax: 0.10.0
libtpu: 0.0.40
codegen_flags: <defaults>
</compile_context>

<pallas_src>
import functools

import jax
import jax.numpy as jnp
import numpy as np
from jax.experimental import pallas as pl
from jax.experimental.pallas import tpu as pltpu

WINDOW_SIZE = 15
SIGMA = 1.5
C1 = 0.01 ** 2
C2 = 0.03 ** 2


def _gaussian_1d(window_size: int, sigma: float) -> np.ndarray:
    # Matches gaussian() in the PyTorch reference.
    seq = np.arange(window_size, dtype=np.float32) - window_size // 2
    g = np.exp(-0.5 * (seq / sigma) ** 2).astype(np.float32)
    return (g / g.sum()).astype(np.float32)


def _band_matrix(n: int, g1d: np.ndarray) -> np.ndarray:
    """(n, n) banded matrix M with M[r, s] = g[s - r + pad].

    M @ x implements the zero-padded "same" 1-D Gaussian conv along the
    leading axis of x (identical to conv2d with padding=window//2)."""
    pad = len(g1d) // 2
    m = np.zeros((n, n), dtype=np.float32)
    for r in range(n):
        for k in range(len(g1d)):
            s = r + k - pad
            if 0 <= s < n:
                m[r, s] = g1d[k]
    return m


def _ssim_kernel(x1_ref, x2_ref, gv_ref, gh_ref, out_ref, acc_ref, *,
                 b_total, b_tile, h, w):
    pid = pl.program_id(0)
    last = pl.num_programs(0) - 1

    @pl.when(pid == 0)
    def _init():
        acc_ref[0] = jnp.float32(0.0)

    gv = gv_ref[...]          # (b_tile*h, b_tile*h) block-diag vertical filter
    gh = gh_ref[...]          # (w, w) horizontal filter
    x1 = x1_ref[...]          # (b_tile*h, w) f32 tile
    x2 = x2_ref[...]

    def dwconv(x):
        # Separable depthwise Gaussian conv as two MXU matmuls
        # (zero padding already folded into the band matrices).
        t = jnp.dot(x, gh, preferred_element_type=jnp.float32)    # horizontal
        return jnp.dot(gv, t, preferred_element_type=jnp.float32)  # vertical

    mu1 = dwconv(x1)
    mu2 = dwconv(x2)
    mu1_sq = mu1 * mu1
    mu2_sq = mu2 * mu2
    mu1_mu2 = mu1 * mu2

    # Serialize the sigma computations so the p*p products die early.
    sigma1_sq = dwconv(x1 * x1) - mu1_sq
    sigma2_sq = dwconv(x2 * x2) - mu2_sq
    sigma12 = dwconv(x1 * x2) - mu1_mu2

    ssim_map = ((2.0 * mu1_mu2 + C1) * (2.0 * sigma12 + C2)) / (
        (mu1_sq + mu2_sq + C1) * (sigma1_sq + sigma2_sq + C2)
    )

    # Mask rows that belong to batch padding (only possible on the last tile).
    valid_rows = jnp.minimum(b_tile, b_total - pid * b_tile) * h
    row_idx = jax.lax.broadcasted_iota(jnp.int32, (b_tile * h, w), 0)
    tile_sum = jnp.sum(jnp.where(row_idx < valid_rows, ssim_map, 0.0))

    acc_ref[0] += tile_sum

    @pl.when(pid == last)
    def _finalize():
        # size_average=True -> global mean over N*C*H*W elements.
        out_ref[0, 0] = acc_ref[0] * (1.0 / float(b_total * h * w))


def ssim(img1: jax.Array, img2: jax.Array) -> jax.Array:
    """SSIM with window_size=15, size_average=True. img1/img2: (N, C, H, W)."""
    assert img1.shape == img2.shape
    N, Cc, H, W = img1.shape
    B = N * Cc
    img1 = img1.astype(jnp.float32)
    img2 = img2.astype(jnp.float32)

    # Tile size along the depthwise (N*C) axis: target ~256 matmul rows/step
    # (keeps per-step VMEM small enough for v7x's 64 MiB while feeding the MXU).
    if H % 8 == 0:
        b_tile = max(1, min(B, max(1, 256 // H)))
    else:
        # Fall back to one whole-array block so block dims equal full dims.
        b_tile = B
    n_tiles = -(-B // b_tile)
    B_pad = n_tiles * b_tile

    x1 = img1.reshape(B, H, W)
    x2 = img2.reshape(B, H, W)
    if B_pad != B:
        # Zero-pad the batch axis only (masked out inside the kernel).
        x1 = jnp.pad(x1, ((0, B_pad - B), (0, 0), (0, 0)))
        x2 = jnp.pad(x2, ((0, B_pad - B), (0, 0), (0, 0)))
    # Free (layout-preserving) reshape: merge (N*C, H) into the sublane axis.
    x1 = x1.reshape(B_pad * H, W)
    x2 = x2.reshape(B_pad * H, W)

    g1d = _gaussian_1d(WINDOW_SIZE, SIGMA)
    gv = _band_matrix(H, g1d)                 # vertical pass (left multiply)
    gh = _band_matrix(W, g1d).T               # horizontal pass (right multiply)
    gv_big = np.kron(np.eye(b_tile, dtype=np.float32), gv)  # block-diag per tile
    gv_big = jnp.asarray(gv_big)
    gh = jnp.asarray(gh)

    rows = b_tile * H
    flops_per_step = 5 * (2 * rows * W * W + 2 * rows * rows * W) + 30 * rows * W
    cost = pl.CostEstimate(
        flops=int(n_tiles * flops_per_step),
        transcendentals=0,
        bytes_accessed=int(2 * B_pad * H * W * 4
                           + gv_big.size * 4 + gh.size * 4 + 4),
    )

    out = pl.pallas_call(
        functools.partial(_ssim_kernel, b_total=B, b_tile=b_tile, h=H, w=W),
        out_shape=jax.ShapeDtypeStruct((1, 1), jnp.float32),
        grid_spec=pltpu.PrefetchScalarGridSpec(
            num_scalar_prefetch=0,
            grid=(n_tiles,),
            in_specs=[
                pl.BlockSpec((rows, W), lambda b: (b, 0)),      # img1 tile
                pl.BlockSpec((rows, W), lambda b: (b, 0)),      # img2 tile
                pl.BlockSpec((rows, rows), lambda b: (0, 0)),   # GV_big (resident)
                pl.BlockSpec((W, W), lambda b: (0, 0)),         # GH (resident)
            ],
            out_specs=pl.BlockSpec(memory_space=pltpu.SMEM),
            scratch_shapes=[pltpu.SMEM((1,), jnp.float32)],
        ),
        compiler_params=pltpu.CompilerParams(
            dimension_semantics=("arbitrary",),
        ),
        cost_estimate=cost,
    )(x1, x2, gv_big, gh)
    return out[0, 0]


def _ssim_reference(img1: jax.Array, img2: jax.Array) -> jax.Array:
    """Pure-JAX reference matching the PyTorch module (for validation)."""
    N, Cc, H, W = img1.shape
    pad = WINDOW_SIZE // 2
    g1d = jnp.asarray(_gaussian_1d(WINDOW_SIZE, SIGMA))
    w2d = jnp.outer(g1d, g1d)[None, None]  # (1, 1, 15, 15)

    def conv(x):
        x = x.reshape(N * Cc, 1, H, W)
        y = jax.lax.conv_general_dilated(
            x, w2d, window_strides=(1, 1), padding=((pad, pad), (pad, pad)))
        return y.reshape(N, Cc, H, W)

    mu1, mu2 = conv(img1), conv(img2)
    mu1_sq, mu2_sq, mu1_mu2 = mu1 * mu1, mu2 * mu2, mu1 * mu2
    s1 = conv(img1 * img1) - mu1_sq
    s2 = conv(img2 * img2) - mu2_sq
    s12 = conv(img1 * img2) - mu1_mu2
    ssim_map = ((2 * mu1_mu2 + C1) * (2 * s12 + C2)) / (
        (mu1_sq + mu2_sq + C1) * (s1 + s2 + C2))
    return jnp.mean(ssim_map)


if __name__ == "__main__":
    key = jax.random.PRNGKey(0)
    k1, k2 = jax.random.split(key)
    # Small NCHW shapes consistent with the module.
    img1 = jax.random.uniform(k1, (2, 4, 16, 16), dtype=jnp.float32)
    img2 = jax.random.uniform(k2, (2, 4, 16, 16), dtype=jnp.float32)

    result = ssim(img1, img2)
    jax.block_until_ready(result)

    # Validate against a pure-JAX reference of the PyTorch module.
    ref = _ssim_reference(img1, img2)
    jax.block_until_ready(ref)
    assert abs(float(result) - float(ref)) < 1e-4, (float(result), float(ref))

    # Self-consistency: SSIM(x, x) must be 1.
    self_sim = ssim(img1, img1)
    jax.block_until_ready(self_sim)
    assert abs(float(self_sim) - 1.0) < 1e-4, float(self_sim)

    print("KERNEL_OK")
</pallas_src>

<mosaic_0001>
module attributes {stable_mosaic.version = 11 : i64} {
  func.func @_ssim_kernel(%arg0: i32, %arg1: memref<128x16xf32, #tpu.memory_space<vmem>>, %arg2: memref<128x16xf32, #tpu.memory_space<vmem>>, %arg3: memref<128x128xf32, #tpu.memory_space<vmem>>, %arg4: memref<16x16xf32, #tpu.memory_space<vmem>>, %arg5: memref<1x1xf32, #tpu.memory_space<smem>>, %arg6: memref<1xf32, #tpu.memory_space<smem>>) attributes {dimension_semantics = [#tpu.dimension_semantics<arbitrary>], iteration_bounds = array<i64: 1>, scalar_prefetch = 0 : i64, scratch_operands = 1 : i64, tpu.core_type = #tpu.core_type<tc>, window_params = [{transform_indices = @transform_0, window_bounds = array<i64: 128, 16>}, {transform_indices = @transform_1, window_bounds = array<i64: 128, 16>}, {pipeline_mode = #tpu.pipeline_mode<synchronous>, transform_indices = @transform_2, window_bounds = array<i64: 128, 128>}, {pipeline_mode = #tpu.pipeline_mode<synchronous>, transform_indices = @transform_3, window_bounds = array<i64: 16, 16>}, {transform_indices = @transform_4, window_bounds = array<i64: 1, 1>}]} {
    %c0_i32 = arith.constant 0 : i32
    %0 = arith.cmpi eq, %arg0, %c0_i32 : i32
    %1 = arith.extui %0 : i1 to i32
    %c0_i32_0 = arith.constant 0 : i32
    %2 = arith.cmpi ne, %1, %c0_i32_0 : i32
    scf.if %2 {
      %cst_31 = arith.constant 0.000000e+00 : f32
      %c0_32 = arith.constant 0 : index
      %62 = memref.load %arg6[%c0_32] : memref<1xf32, #tpu.memory_space<smem>>
      memref.store %cst_31, %arg6[%c0_32] : memref<1xf32, #tpu.memory_space<smem>>
    } else {
    }
    %c0 = arith.constant 0 : index
    %c0_1 = arith.constant 0 : index
    %3 = vector.load %arg3[%c0, %c0_1] : memref<128x128xf32, #tpu.memory_space<vmem>>, vector<128x128xf32>
    %c0_2 = arith.constant 0 : index
    %c0_3 = arith.constant 0 : index
    %4 = vector.load %arg4[%c0_2, %c0_3] : memref<16x16xf32, #tpu.memory_space<vmem>>, vector<16x16xf32>
    %c0_4 = arith.constant 0 : index
    %c0_5 = arith.constant 0 : index
    %5 = vector.load %arg1[%c0_4, %c0_5] : memref<128x16xf32, #tpu.memory_space<vmem>>, vector<128x16xf32>
    %c0_6 = arith.constant 0 : index
    %c0_7 = arith.constant 0 : index
    %6 = vector.load %arg2[%c0_6, %c0_7] : memref<128x16xf32, #tpu.memory_space<vmem>>, vector<128x16xf32>
    %cst = arith.constant dense<0.000000e+00> : vector<128x16xf32>
    %7 = tpu.matmul %5, %4, %cst {dimension_numbers = #tpu.dot_dimension_numbers<[1], [0], [0], [1], [0, 0, 1, 1], [], []>} : vector<128x16xf32>, vector<16x16xf32>, vector<128x16xf32> -> vector<128x16xf32>
    %cst_8 = arith.constant dense<0.000000e+00> : vector<128x16xf32>
    %8 = tpu.matmul %3, %7, %cst_8 {dimension_numbers = #tpu.dot_dimension_numbers<[1], [0], [0], [1], [0, 0, 1, 1], [], []>} : vector<128x128xf32>, vector<128x16xf32>, vector<128x16xf32> -> vector<128x16xf32>
    %cst_9 = arith.constant dense<0.000000e+00> : vector<128x16xf32>
    %9 = tpu.matmul %6, %4, %cst_9 {dimension_numbers = #tpu.dot_dimension_numbers<[1], [0], [0], [1], [0, 0, 1, 1], [], []>} : vector<128x16xf32>, vector<16x16xf32>, vector<128x16xf32> -> vector<128x16xf32>
    %cst_10 = arith.constant dense<0.000000e+00> : vector<128x16xf32>
    %10 = tpu.matmul %3, %9, %cst_10 {dimension_numbers = #tpu.dot_dimension_numbers<[1], [0], [0], [1], [0, 0, 1, 1], [], []>} : vector<128x128xf32>, vector<128x16xf32>, vector<128x16xf32> -> vector<128x16xf32>
    %11 = arith.mulf %8, %8 : vector<128x16xf32>
    %12 = arith.mulf %10, %10 : vector<128x16xf32>
    %13 = arith.mulf %8, %10 : vector<128x16xf32>
    %14 = arith.mulf %5, %5 : vector<128x16xf32>
    %cst_11 = arith.constant dense<0.000000e+00> : vector<128x16xf32>
    %15 = tpu.matmul %14, %4, %cst_11 {dimension_numbers = #tpu.dot_dimension_numbers<[1], [0], [0], [1], [0, 0, 1, 1], [], []>} : vector<128x16xf32>, vector<16x16xf32>, vector<128x16xf32> -> vector<128x16xf32>
    %cst_12 = arith.constant dense<0.000000e+00> : vector<128x16xf32>
    %16 = tpu.matmul %3, %15, %cst_12 {dimension_numbers = #tpu.dot_dimension_numbers<[1], [0], [0], [1], [0, 0, 1, 1], [], []>} : vector<128x128xf32>, vector<128x16xf32>, vector<128x16xf32> -> vector<128x16xf32>
    %17 = arith.subf %16, %11 : vector<128x16xf32>
    %18 = arith.mulf %6, %6 : vector<128x16xf32>
    %cst_13 = arith.constant dense<0.000000e+00> : vector<128x16xf32>
    %19 = tpu.matmul %18, %4, %cst_13 {dimension_numbers = #tpu.dot_dimension_numbers<[1], [0], [0], [1], [0, 0, 1, 1], [], []>} : vector<128x16xf32>, vector<16x16xf32>, vector<128x16xf32> -> vector<128x16xf32>
    %cst_14 = arith.constant dense<0.000000e+00> : vector<128x16xf32>
    %20 = tpu.matmul %3, %19, %cst_14 {dimension_numbers = #tpu.dot_dimension_numbers<[1], [0], [0], [1], [0, 0, 1, 1], [], []>} : vector<128x128xf32>, vector<128x16xf32>, vector<128x16xf32> -> vector<128x16xf32>
    %21 = arith.subf %20, %12 : vector<128x16xf32>
    %22 = arith.mulf %5, %6 : vector<128x16xf32>
    %cst_15 = arith.constant dense<0.000000e+00> : vector<128x16xf32>
    %23 = tpu.matmul %22, %4, %cst_15 {dimension_numbers = #tpu.dot_dimension_numbers<[1], [0], [0], [1], [0, 0, 1, 1], [], []>} : vector<128x16xf32>, vector<16x16xf32>, vector<128x16xf32> -> vector<128x16xf32>
    %cst_16 = arith.constant dense<0.000000e+00> : vector<128x16xf32>
    %24 = tpu.matmul %3, %23, %cst_16 {dimension_numbers = #tpu.dot_dimension_numbers<[1], [0], [0], [1], [0, 0, 1, 1], [], []>} : vector<128x128xf32>, vector<128x16xf32>, vector<128x16xf32> -> vector<128x16xf32>
    %25 = arith.subf %24, %13 : vector<128x16xf32>
    %cst_17 = arith.constant 2.000000e+00 : f32
    %26 = vector.broadcast %cst_17 : f32 to vector<128x16xf32>
    %27 = arith.mulf %26, %13 : vector<128x16xf32>
    %cst_18 = arith.constant 9.99999974E-5 : f32
    %28 = vector.broadcast %cst_18 : f32 to vector<128x16xf32>
    %29 = arith.addf %27, %28 : vector<128x16xf32>
    %cst_19 = arith.constant 2.000000e+00 : f32
    %30 = vector.broadcast %cst_19 : f32 to vector<128x16xf32>
    %31 = arith.mulf %30, %25 : vector<128x16xf32>
    %cst_20 = arith.constant 8.99999984E-4 : f32
    %32 = vector.broadcast %cst_20 : f32 to vector<128x16xf32>
    %33 = arith.addf %31, %32 : vector<128x16xf32>
    %34 = arith.mulf %29, %33 : vector<128x16xf32>
    %35 = arith.addf %11, %12 : vector<128x16xf32>
    %cst_21 = arith.constant 9.99999974E-5 : f32
    %36 = vector.broadcast %cst_21 : f32 to vector<128x16xf32>
    %37 = arith.addf %35, %36 : vector<128x16xf32>
    %38 = arith.addf %17, %21 : vector<128x16xf32>
    %cst_22 = arith.constant 8.99999984E-4 : f32
    %39 = vector.broadcast %cst_22 : f32 to vector<128x16xf32>
    %40 = arith.addf %38, %39 : vector<128x16xf32>
    %41 = arith.mulf %37, %40 : vector<128x16xf32>
    %42 = arith.divf %34, %41 : vector<128x16xf32>
    %c8_i32 = arith.constant 8 : i32
    %43 = arith.muli %arg0, %c8_i32 : i32
    %c8_i32_23 = arith.constant 8 : i32
    %44 = arith.subi %c8_i32_23, %43 : i32
    %c8_i32_24 = arith.constant 8 : i32
    %45 = arith.minsi %c8_i32_24, %44 : i32
    %c16_i32 = arith.constant 16 : i32
    %46 = arith.muli %45, %c16_i32 : i32
    %47 = tpu.iota {dimensions = array<i32: 0>} : vector<128x16xi32>
    %48 = vector.broadcast %46 : i32 to vector<128x16xi32>
    %49 = arith.cmpi slt, %47, %48 : vector<128x16xi32>
    %cst_25 = arith.constant 0.000000e+00 : f32
    %50 = vector.broadcast %cst_25 : f32 to vector<128x16xf32>
    %51 = arith.select %49, %42, %50 : vector<128x16xi1>, vector<128x16xf32>
    %52 = vector.shape_cast %51 : vector<128x16xf32> to vector<1x128x16xf32>
    %cst_26 = arith.constant dense<0.000000e+00> : vector<1xf32>
    %53 = vector.multi_reduction <add>, %52, %cst_26 [1, 2] : vector<1x128x16xf32> to vector<1xf32>
    %54 = vector.shape_cast %53 : vector<1xf32> to vector<1x1x1xf32>
    %55 = vector.extract %54[0, 0, 0] : f32 from vector<1x1x1xf32>
    %c0_27 = arith.constant 0 : index
    %56 = memref.load %arg6[%c0_27] : memref<1xf32, #tpu.memory_space<smem>>
    %57 = arith.addf %56, %55 : f32
    %c0_28 = arith.constant 0 : index
    %58 = memref.load %arg6[%c0_28] : memref<1xf32, #tpu.memory_space<smem>>
    memref.store %57, %arg6[%c0_28] : memref<1xf32, #tpu.memory_space<smem>>
    %c0_i32_29 = arith.constant 0 : i32
    %59 = arith.cmpi eq, %arg0, %c0_i32_29 : i32
    %60 = arith.extui %59 : i1 to i32
    %c0_i32_30 = arith.constant 0 : i32
    %61 = arith.cmpi ne, %60, %c0_i32_30 : i32
    scf.if %61 {
      %c0_31 = arith.constant 0 : index
      %62 = memref.load %arg6[%c0_31] : memref<1xf32, #tpu.memory_space<smem>>
      %cst_32 = arith.constant 4.8828125E-4 : f32
      %63 = arith.mulf %62, %cst_32 : f32
      %c0_33 = arith.constant 0 : index
      %c0_34 = arith.constant 0 : index
      %64 = memref.load %arg5[%c0_33, %c0_34] : memref<1x1xf32, #tpu.memory_space<smem>>
      memref.store %63, %arg5[%c0_33, %c0_34] : memref<1x1xf32, #tpu.memory_space<smem>>
    } else {
    }
    return
  }
  func.func @transform_0(%arg0: i32) -> (i32, i32) {
    %c0_i32 = arith.constant 0 : i32
    %c0_i32_0 = arith.constant 0 : i32
    return %arg0, %c0_i32 : i32, i32
  }
  func.func @transform_1(%arg0: i32) -> (i32, i32) {
    %c0_i32 = arith.constant 0 : i32
    %c0_i32_0 = arith.constant 0 : i32
    return %arg0, %c0_i32 : i32, i32
  }
  func.func @transform_2(%arg0: i32) -> (i32, i32) {
    %c0_i32 = arith.constant 0 : i32
    %c0_i32_0 = arith.constant 0 : i32
    %c0_i32_1 = arith.constant 0 : i32
    return %c0_i32, %c0_i32_0 : i32, i32
  }
  func.func @transform_3(%arg0: i32) -> (i32, i32) {
    %c0_i32 = arith.constant 0 : i32
    %c0_i32_0 = arith.constant 0 : i32
    %c0_i32_1 = arith.constant 0 : i32
    return %c0_i32, %c0_i32_0 : i32, i32
  }
  func.func @transform_4(%arg0: i32) -> (i32, i32) {
    %c0_i32 = arith.constant 0 : i32
    %c0_i32_0 = arith.constant 0 : i32
    %c0_i32_1 = arith.constant 0 : i32
    return %c0_i32, %c0_i32_0 : i32, i32
  }
}

</mosaic_0001>

<bundles_post_ra>
// kernel: tpu_custom_call.1
= control target key start
LH: loop header
LB: loop body
LE: loop exit
PB: predicated region body
PF: predicated region fallthrough
CT: control target
= control target key end

     0   :  { %vm74_vm0 = vcmask 130048   ;;  %s4268_s0 = inlined_call_operand.vmem [shape: f32[128,16], index: 0, kind: input, shape index: {}]   ;;  %s4269_s1 = inlined_call_operand.vmem [shape: f32[128,16], index: 1, kind: input, shape index: {}]   ;;  %s4270_s2 = inlined_call_operand.vmem [shape: f32[128,128], index: 2, kind: input, shape index: {}]   ;;  %s4271_s3 = inlined_call_operand.vmem [shape: f32[16,16], index: 3, kind: input, shape index: {}]   ;;  %s4272_s4 = inlined_call_operand.hbm [shape: f32[1,1], index: 4, kind: output, shape index: {}]  }
   0x1   :  { %v40_v0 = vld [vmem:[%s4271_s3] sm:$0xff]  ;;  %v41_v1 = vld [vmem:[%s4271_s3 + $0x8] sm:$0xff]  ;;  %v3274_v7 = vld [vmem:[%s4268_s0 + $0x10] sm:$0xff] }
   0x2   :  { %v3248_v2 = vld [vmem:[%s4268_s0] sm:$0xff]  ;;  %v3250_v3 = vpack.c.bf16 %v41_v1, %v40_v0  ;;  %v3257_v4 = vld [vmem:[%s4268_s0 + $0x8] sm:$0xff]  ;;  %v3279_v8 = vld [vmem:[%s4268_s0 + $0x18] sm:$0xff] }
   0x3   :  { %2554 = vmatprep.mubr.msk.f32.mxu0 %vm74_vm0, %v3248_v2  ;;  %v3262_v5 = vld [vmem:[%s4269_s1 + $0x8] sm:$0xff]  ;;  %v3284_v9 = vld [vmem:[%s4268_s0 + $0x20] sm:$0xff]  ;;  %v3301_v12 = vld [vmem:[%s4268_s0 + $0x30] sm:$0xff] }
   0x4   :  { %v3266_v6 = vmul.f32 %v3262_v5, %v3257_v4  ;;  %2971 = vmatprep.subr.bf16.mxu0 %v3250_v3  ;;  %v3289_v10 = vld [vmem:[%s4268_s0 + $0x28] sm:$0xff]  ;;  %v3294_v11 = vld [vmem:[%s4269_s1] sm:$0xff]  ;;  %v3306_v13 = vld [vmem:[%s4268_s0 + $0x38] sm:$0xff] }
   0x5   :  { %2973 = vmatpush3.bf16.msra.mxu0 %v3250_v3  ;;  %v3310_v14 = vmul.f32 %v3294_v11, %v3248_v2  ;;  %v3315_v15 = vld [vmem:[%s4269_s1 + $0x10] sm:$0xff]  ;;  %v3320_v16 = vld [vmem:[%s4269_s1 + $0x18] sm:$0xff]  ;;  %v3328_v17 = vld [vmem:[%s4268_s0 + $0x40] sm:$0xff] }
   0x6   :  { %3007 = vmatprep.subr.bf16.mxu0 %v3250_v3  ;;  %v3333_v18 = vld [vmem:[%s4268_s0 + $0x48] sm:$0xff]  ;;  %v3337_v19 = vmul.f32 %v3315_v15, %v3274_v7  ;;  %v3341_v20 = vmul.f32 %v3320_v16, %v3279_v8  ;;  %v3346_v21 = vld [vmem:[%s4269_s1 + $0x20] sm:$0xff]  ;;  %v3356_v23 = vld [vmem:[%s4268_s0 + $0x50] sm:$0xff] }
   0x7   :  { %v3351_v22 = vld [vmem:[%s4269_s1 + $0x28] sm:$0xff]  ;;  %v3361_v24 = vld [vmem:[%s4268_s0 + $0x58] sm:$0xff]  ;;  %v3366_v25 = vmul.f32 %v3346_v21, %v3284_v9  ;;  %v3375_v27 = vld [vmem:[%s4269_s1 + $0x30] sm:$0xff] }
   0x8   :  { %2555 = vmatmul.mubr.msk.f32.vlgmr.msra.gmra.mrb[0].mxu0 %vm74_vm0, %v3257_v4  ;;  %v3370_v26 = vmul.f32 %v3351_v22, %v3289_v10  ;;  %v3380_v28 = vld [vmem:[%s4269_s1 + $0x38] sm:$0xff]  ;;  %v3385_v29 = vld [vmem:[%s4268_s0 + $0x60] sm:$0xff]  ;;  %v3390_v30 = vld [vmem:[%s4268_s0 + $0x68] sm:$0xff]  ;;  %v3394_v31 = vmul.f32 %v3375_v27, %v3301_v12 }
   0x9   :  { %3009 = vmatpush3.bf16.msra.mxu0 %v3250_v3  ;;  %2557 = vmatprep.mubr.msk.f32.mxu0 %vm74_vm0, %v3274_v7  ;;  %v3398_v32 = vmul.f32 %v3380_v28, %v3306_v13  ;;  %v3403_v33 = vld [vmem:[%s4269_s1 + $0x40] sm:$0xff]  ;;  %v3408_v34 = vld [vmem:[%s4269_s1 + $0x48] sm:$0xff]  ;;  %v3423_v37 = vld [vmem:[%s4269_s1 + $0x50] sm:$0xff] }
   0xa   :  { %3043 = vmatprep.subr.bf16.mxu0 %v3250_v3  ;;  %v3414_v35 = vmul.f32 %v3403_v33, %v3328_v17  ;;  %v3418_v36 = vmul.f32 %v3408_v34, %v3333_v18  ;;  %v3428_v38 = vld [vmem:[%s4269_s1 + $0x58] sm:$0xff] }
   0xc   :  { %2558 = vmatmul.mubr.msk.f32.gmra.mrb[2].mxu0 %vm74_vm0, %v3279_v8 }
   0xd   :  { %9 = vsyncpa [#allocation4], 0  ;;  %2560 = vmatprep.mubr.msk.f32.mxu0 %vm74_vm0, %v3284_v9  ;;  %v3435_v39 = vld [vmem:[%s4268_s0 + $0x70] sm:$0xff]  ;;  %v3439_v40 = vmul.f32 %v3423_v37, %v3356_v23  ;;  %v3443_v41 = vmul.f32 %v3428_v38, %v3361_v24  ;;  %v3448_v42 = vld [vmem:[%s4269_s1 + $0x60] sm:$0xff]  ;;  %v799_v51 = vmul.f32 %v3248_v2, %v3248_v2  ;;  %v800_v52 = vmul.f32 %v3257_v4, %v3257_v4  ;;  %s3201_s6 = scalar_lea.hbm %s4272_s4, 16 }
   0xe   :  { %v3453_v43 = vld [vmem:[%s4269_s1 + $0x68] sm:$0xff]  ;;  %v3458_v44 = vld [vmem:[%s4268_s0 + $0x78] sm:$0xff]  ;;  %v3462_v45 = vmul.f32 %v3448_v42, %v3385_v29  ;;  %v3471_v47 = vld [vmem:[%s4269_s1 + $0x70] sm:$0xff]  ;;  %v801_v53 = vmul.f32 %v3274_v7, %v3274_v7  ;;  %v802_v54 = vmul.f32 %v3279_v8, %v3279_v8  ;;  %v803_v55 = vmul.f32 %v3284_v9, %v3284_v9  ;;  %p3202_p0 = scmp.ne.s32.totalorder %s4272_s4, %s3201_s6  ;;  %p3205_p1 = scmp.lt.u32.totalorder %s3201_s6, %s4272_s4 }
   0xf   :  { %v3466_v46 = vmul.f32 %v3453_v43, %v3390_v30  ;;  %v3476_v48 = vld [vmem:[%s4269_s1 + $0x78] sm:$0xff]  ;;  %v3480_v49 = vmul.f32 %v3471_v47, %v3435_v39  ;;  %v804_v56 = vmul.f32 %v3289_v10, %v3289_v10  ;;  %v805_v57 = vmul.f32 %v3301_v12, %v3301_v12 }
  0x10   :  { %v3484_v50 = vmul.f32 %v3476_v48, %v3458_v44  ;;  %2561 = vmatmul.mubr.msk.f32.gmra.mrb[4].mxu0 %vm74_vm0, %v3289_v10  ;;  %v806_v58 = vmul.f32 %v3306_v13, %v3306_v13  ;;  %v807_v59 = vmul.f32 %v3328_v17, %v3328_v17  ;;  %v808_v60 = vmul.f32 %v3333_v18, %v3333_v18  ;;  %p3207_p2 = pnand %p3205_p1, %p3202_p0 }
  0x11   :  { %2563 = vmatprep.mubr.msk.f32.mxu0 %vm74_vm0, %v3301_v12  ;;  %v809_v61 = vmul.f32 %v3356_v23, %v3356_v23  ;;  %v810_v62 = vmul.f32 %v3361_v24, %v3361_v24  ;;  %v811_v63 = vmul.f32 %v3385_v29, %v3385_v29  ;;  %v812_v0 = vmul.f32 %v3390_v30, %v3390_v30 }
  0x12   :  { %v813_v1 = vmul.f32 %v3435_v39, %v3435_v39  ;;  %v814_v2 = vmul.f32 %v3458_v44, %v3458_v44  ;;  %v1169_v4 = vmul.f32 %v3294_v11, %v3294_v11  ;;  %v1170_v7 = vmul.f32 %v3262_v5, %v3262_v5 }
  0x13   :  { %v1171_v8 = vmul.f32 %v3315_v15, %v3315_v15  ;;  %v1172_v9 = vmul.f32 %v3320_v16, %v3320_v16  ;;  %v1173_v10 = vmul.f32 %v3346_v21, %v3346_v21  ;;  %v1176_v12 = vmul.f32 %v3380_v28, %v3380_v28 }
  0x14   :  { %2564 = vmatmul.mubr.msk.f32.gmra.mrb[6].mxu0 %vm74_vm0, %v3306_v13  ;;  %v1178_v13 = vmul.f32 %v3408_v34, %v3408_v34 }
  0x15   :  { %2566 = vmatprep.mubr.msk.f32.mxu0 %vm74_vm0, %v3328_v17  ;;  %v1181_v17 = vmul.f32 %v3448_v42, %v3448_v42 }
  0x18   :  { %2567 = vmatmul.mubr.msk.f32.gmra.mrb[8].mxu0 %vm74_vm0, %v3333_v18  ;;  %v1182_v18 = vmul.f32 %v3453_v43, %v3453_v43 }
  0x19   :  { %2569 = vmatprep.mubr.msk.f32.mxu0 %vm74_vm0, %v3356_v23  ;;  %v1184_v23 = vmul.f32 %v3476_v48, %v3476_v48 }
  0x1c   :  { %2570 = vmatmul.mubr.msk.f32.gmra.mrb[10].mxu0 %vm74_vm0, %v3361_v24 }
  0x1d   :  { %2572 = vmatprep.mubr.msk.f32.mxu0 %vm74_vm0, %v3385_v29 }
  0x20   :  { %2573 = vmatmul.mubr.msk.f32.gmra.mrb[12].mxu0 %vm74_vm0, %v3390_v30 }
  0x21   :  { %2575 = vmatprep.mubr.msk.f32.mxu0 %vm74_vm0, %v3435_v39 }
  0x24   :  { %2576 = vmatmul.mubr.msk.f32.gmra.mrb[14].mxu0 %vm74_vm0, %v3458_v44 }
  0x25   :  { %2638 = vmatprep.mubr.msk.f32.mxu0 %vm74_vm0, %v3294_v11  ;;  %v1175_v11 = vmul.f32 %v3375_v27, %v3375_v27 }
  0x28   :  { %2639 = vmatmul.mubr.msk.f32.vlgmr.msra.gmra.mrb[16].mxu0 %vm74_vm0, %v3262_v5  ;;  %v1174_v5 = vmul.f32 %v3351_v22, %v3351_v22 }
  0x29   :  { %3045 = vmatpush3.bf16.msra.mxu0 %v3250_v3  ;;  %2641 = vmatprep.mubr.msk.f32.mxu0 %vm74_vm0, %v3315_v15  ;;  %v1179_v15 = vmul.f32 %v3423_v37, %v3423_v37 }
  0x2a   :  { %3079 = vmatprep.subr.bf16.mxu0 %v3250_v3 }
  0x2c   :  { %2642 = vmatmul.mubr.msk.f32.gmra.mrb[18].mxu0 %vm74_vm0, %v3320_v16  ;;  %v1180_v16 = vmul.f32 %v3428_v38, %v3428_v38 }
  0x2d   :  { %2644 = vmatprep.mubr.msk.f32.mxu0 %vm74_vm0, %v3346_v21  ;;  %v1183_v21 = vmul.f32 %v3471_v47, %v3471_v47 }
  0x30   :  { %2645 = vmatmul.mubr.msk.f32.gmra.mrb[20].mxu0 %vm74_vm0, %v3351_v22  ;;  %v3639_v22 = vld [vmem:[%s4270_s2] sm:$0xff] }
  0x31   :  { %2647 = vmatprep.mubr.msk.f32.mxu0 %vm74_vm0, %v3375_v27  ;;  %2610 = vmatprep.mubr.f32.mxu1 %v3639_v22 }
  0x34   :  { %2648 = vmatmul.mubr.msk.f32.gmra.mrb[22].mxu0 %vm74_vm0, %v3380_v28 }
  0x35   :  { %2650 = vmatprep.mubr.msk.f32.mxu0 %vm74_vm0, %v3403_v33 }
  0x38   :  { %2651 = vmatmul.mubr.msk.f32.gmra.mrb[24].mxu0 %vm74_vm0, %v3408_v34 }
  0x39   :  { %2653 = vmatprep.mubr.msk.f32.mxu0 %vm74_vm0, %v3423_v37 }
  0x3c   :  { %2654 = vmatmul.mubr.msk.f32.gmra.mrb[26].mxu0 %vm74_vm0, %v3428_v38 }
  0x3d   :  { %2656 = vmatprep.mubr.msk.f32.mxu0 %vm74_vm0, %v3448_v42 }
  0x40   :  { %2657 = vmatmul.mubr.msk.f32.gmra.mrb[28].mxu0 %vm74_vm0, %v3453_v43 }
  0x41   :  { %2659 = vmatprep.mubr.msk.f32.mxu0 %vm74_vm0, %v3471_v47 }
  0x44   :  { %2660 = vmatmul.mubr.msk.f32.gmra.mrb[30].mxu0 %vm74_vm0, %v3476_v48  ;;  %v3688_v48 = vld [vmem:[%s4270_s2 + $0x10] sm:$0xff] }
  0x45   :  { %2722 = vmatprep.mubr.msk.f32.mxu0 %vm74_vm0, %v799_v51  ;;  %v3695_v51 = vld [vmem:[%s4270_s2 + $0x18] sm:$0xff] }
  0x48   :  { %2723 = vmatmul.mubr.msk.f32.vlgmr.msra.gmra.mrb[32].mxu0 %vm74_vm0, %v800_v52 }
  0x49   :  { %3081 = vmatpush3.bf16.msra.mxu0 %v3250_v3  ;;  %2725 = vmatprep.mubr.msk.f32.mxu0 %vm74_vm0, %v801_v53  ;;  %v3700_v53 = vld [vmem:[%s4270_s2 + $0x20] sm:$0xff] }
  0x4a   :  { %3115 = vmatprep.subr.bf16.mxu0 %v3250_v3 }
  0x4c   :  { %2726 = vmatmul.mubr.msk.f32.gmra.mrb[34].mxu0 %vm74_vm0, %v802_v54 }
  0x4d   :  { %2728 = vmatprep.mubr.msk.f32.mxu0 %vm74_vm0, %v803_v55 }
  0x50   :  { %2729 = vmatmul.mubr.msk.f32.gmra.mrb[36].mxu0 %vm74_vm0, %v804_v56  ;;  %v3707_v56 = vld [vmem:[%s4270_s2 + $0x28] sm:$0xff] }
  0x51   :  { %2731 = vmatprep.mubr.msk.f32.mxu0 %vm74_vm0, %v805_v57 }
  0x54   :  { %2732 = vmatmul.mubr.msk.f32.gmra.mrb[38].mxu0 %vm74_vm0, %v806_v58  ;;  %v3712_v58 = vld [vmem:[%s4270_s2 + $0x30] sm:$0xff] }
  0x55   :  { %2734 = vmatprep.mubr.msk.f32.mxu0 %vm74_vm0, %v807_v59 }
  0x58   :  { %2735 = vmatmul.mubr.msk.f32.gmra.mrb[40].mxu0 %vm74_vm0, %v808_v60 }
  0x59   :  { %2737 = vmatprep.mubr.msk.f32.mxu0 %vm74_vm0, %v809_v61  ;;  %v3719_v61 = vld [vmem:[%s4270_s2 + $0x38] sm:$0xff] }
  0x5c   :  { %2738 = vmatmul.mubr.msk.f32.gmra.mrb[42].mxu0 %vm74_vm0, %v810_v62 }
  0x5d   :  { %2740 = vmatprep.mubr.msk.f32.mxu0 %vm74_vm0, %v811_v63  ;;  %v3724_v63 = vld [vmem:[%s4270_s2 + $0x40] sm:$0xff] }
  0x60   :  { %2741 = vmatmul.mubr.msk.f32.gmra.mrb[44].mxu0 %vm74_vm0, %v812_v0 }
  0x61   :  { %2743 = vmatprep.mubr.msk.f32.mxu0 %vm74_vm0, %v813_v1 }
  0x64   :  { %2744 = vmatmul.mubr.msk.f32.gmra.mrb[46].mxu0 %vm74_vm0, %v814_v2  ;;  %v3731_v2 = vld [vmem:[%s4270_s2 + $0x48] sm:$0xff] }
  0x65   :  { %2806 = vmatprep.mubr.msk.f32.mxu0 %vm74_vm0, %v1169_v4 }
  0x68   :  { %2807 = vmatmul.mubr.msk.f32.vlgmr.msra.gmra.mrb[48].mxu0 %vm74_vm0, %v1170_v7  ;;  %v3736_v7 = vld [vmem:[%s4270_s2 + $0x50] sm:$0xff] }
  0x69   :  { %3117 = vmatpush3.bf16.msra.mxu0 %v3250_v3  ;;  %2809 = vmatprep.mubr.msk.f32.mxu0 %vm74_vm0, %v1171_v8  ;;  %v1177_v3 = vmul.f32 %v3403_v33, %v3403_v33 }
  0x6c   :  { %2810 = vmatmul.mubr.msk.f32.gmra.mrb[50].mxu0 %vm74_vm0, %v1172_v9 }
  0x6d   :  { %2812 = vmatprep.mubr.msk.f32.mxu0 %vm74_vm0, %v1173_v10  ;;  %v3743_v10 = vld [vmem:[%s4270_s2 + $0x58] sm:$0xff] }
  0x70   :  { %2813 = vmatmul.mubr.msk.f32.gmra.mrb[52].mxu0 %vm74_vm0, %v1174_v5 }
  0x71   :  { %2815 = vmatprep.mubr.msk.f32.mxu0 %vm74_vm0, %v1175_v11  ;;  %v3748_v11 = vld [vmem:[%s4270_s2 + $0x60] sm:$0xff] }
  0x74   :  { %2816 = vmatmul.mubr.msk.f32.gmra.mrb[54].mxu0 %vm74_vm0, %v1176_v12 }
  0x75   :  { %2818 = vmatprep.mubr.msk.f32.mxu0 %vm74_vm0, %v1177_v3 }
  0x78   :  { %2819 = vmatmul.mubr.msk.f32.gmra.mrb[56].mxu0 %vm74_vm0, %v1178_v13  ;;  %v3755_v13 = vld [vmem:[%s4270_s2 + $0x68] sm:$0xff] }
  0x79   :  { %2821 = vmatprep.mubr.msk.f32.mxu0 %vm74_vm0, %v1179_v15 }
  0x7c   :  { %2822 = vmatmul.mubr.msk.f32.gmra.mrb[58].mxu0 %vm74_vm0, %v1180_v16  ;;  %v3760_v16 = vld [vmem:[%s4270_s2 + $0x70] sm:$0xff] }
  0x7d   :  { %2824 = vmatprep.mubr.msk.f32.mxu0 %vm74_vm0, %v1181_v17 }
  0x80   :  { %2825 = vmatmul.mubr.msk.f32.gmra.mrb[60].mxu0 %vm74_vm0, %v1182_v18 }
  0x81   :  { %2827 = vmatprep.mubr.msk.f32.mxu0 %vm74_vm0, %v1183_v21  ;;  %v3767_v21 = vld [vmem:[%s4270_s2 + $0x78] sm:$0xff] }
  0x84   :  { %2828 = vmatmul.mubr.msk.f32.gmra.mrb[62].mxu0 %vm74_vm0, %v1184_v23 }
  0x85   :  { %2890 = vmatprep.mubr.msk.f32.mxu0 %vm74_vm0, %v3310_v14 }
  0x88   :  { %2891 = vmatmul.mubr.msk.f32.vlgmr.msra.gmra.mrb[64].mxu0 %vm74_vm0, %v3266_v6 }
  0x89   :  { %2893 = vmatprep.mubr.msk.f32.mxu0 %vm74_vm0, %v3337_v19 }
  0x8c   :  { %2894 = vmatmul.mubr.msk.f32.gmra.mrb[66].mxu0 %vm74_vm0, %v3341_v20 }
  0x8d   :  { %2896 = vmatprep.mubr.msk.f32.mxu0 %vm74_vm0, %v3366_v25 }
  0x90   :  { %2897 = vmatmul.mubr.msk.f32.gmra.mrb[68].mxu0 %vm74_vm0, %v3370_v26 }
  0x91   :  { %2899 = vmatprep.mubr.msk.f32.mxu0 %vm74_vm0, %v3394_v31 }
  0x94   :  { %2900 = vmatmul.mubr.msk.f32.gmra.mrb[70].mxu0 %vm74_vm0, %v3398_v32 }
  0x95   :  { %2902 = vmatprep.mubr.msk.f32.mxu0 %vm74_vm0, %v3414_v35 }
  0x98   :  { %2903 = vmatmul.mubr.msk.f32.gmra.mrb[72].mxu0 %vm74_vm0, %v3418_v36 }
  0x99   :  { %2905 = vmatprep.mubr.msk.f32.mxu0 %vm74_vm0, %v3439_v40 }
  0x9c   :  { %2906 = vmatmul.mubr.msk.f32.gmra.mrb[74].mxu0 %vm74_vm0, %v3443_v41 }
  0x9d   :  { %2908 = vmatprep.mubr.msk.f32.mxu0 %vm74_vm0, %v3462_v45 }
  0xa0   :  { %2909 = vmatmul.mubr.msk.f32.gmra.mrb[76].mxu0 %vm74_vm0, %v3466_v46  ;;  %v3683_v46 = vld [vmem:[%s4270_s2 + $0x8] sm:$0xff] }
  0xa1   :  { %2911 = vmatprep.mubr.msk.f32.mxu0 %vm74_vm0, %v3480_v49 }
  0xa4   :  { %2912 = vmatmul.mubr.msk.f32.gmra.mrb[78].mxu0 %vm74_vm0, %v3484_v50 }
  0xa5   :  { %2946 = vmatprep.mubr.f32.mxu0 %v3639_v22 }
  0xdb   :  { %v2556_v6 = vpop.f32.mrb[0].mxu0 }
  0xdc   :  { %v189_v14 = vpop.f32.mrb[1].mxu0 }
  0xdd   :  { %v2974_v19 = vpack.c.bf16 %v2556_v6, %v189_v14 }
  0xdf   :  { %v2559_v20 = vpop.f32.mrb[2].mxu0  ;;  %2975 = vmatprep.subr.bf16.mxu1 %v2974_v19 }
  0xe0   :  { %v199_v24 = vpop.f32.mrb[3].mxu0  ;;  %2977 = vmatpush3.bf16.msra.mxu1 %v2974_v19 }
  0xe1   :  { %v2978_v25 = vpack.c.bf16 %v2559_v20, %v199_v24 }
  0xe3   :  { %v2562_v26 = vpop.f32.mrb[4].mxu0  ;;  %2979 = vmatprep.subr.bf16.mxu1 %v2978_v25 }
  0xe4   :  { %v209_v27 = vpop.f32.mrb[5].mxu0  ;;  %2981 = vmatpush3.bf16.msra.mxu1 %v2978_v25 }
  0xe5   :  { %v2982_v28 = vpack.c.bf16 %v2562_v26, %v209_v27 }
  0xe7   :  { %v2565_v29 = vpop.f32.mrb[6].mxu0  ;;  %2983 = vmatprep.subr.bf16.mxu1 %v2982_v28 }
  0xe8   :  { %v219_v30 = vpop.f32.mrb[7].mxu0  ;;  %2985 = vmatpush3.bf16.msra.mxu1 %v2982_v28 }
  0xe9   :  { %v2986_v31 = vpack.c.bf16 %v2565_v29, %v219_v30 }
  0xeb   :  { %v2568_v32 = vpop.f32.mrb[8].mxu0  ;;  %2987 = vmatprep.subr.bf16.mxu1 %v2986_v31 }
  0xec   :  { %v229_v33 = vpop.f32.mrb[9].mxu0  ;;  %2989 = vmatpush3.bf16.msra.mxu1 %v2986_v31 }
  0xed   :  { %v2990_v34 = vpack.c.bf16 %v2568_v32, %v229_v33 }
  0xef   :  { %v2571_v35 = vpop.f32.mrb[10].mxu0  ;;  %2991 = vmatprep.subr.bf16.mxu1 %v2990_v34 }
  0xf0   :  { %v239_v36 = vpop.f32.mrb[11].mxu0  ;;  %2993 = vmatpush3.bf16.msra.mxu1 %v2990_v34 }
  0xf1   :  { %v2994_v37 = vpack.c.bf16 %v2571_v35, %v239_v36 }
  0xf3   :  { %v2574_v38 = vpop.f32.mrb[12].mxu0  ;;  %2995 = vmatprep.subr.bf16.mxu1 %v2994_v37 }
  0xf4   :  { %v249_v39 = vpop.f32.mrb[13].mxu0  ;;  %2997 = vmatpush3.bf16.msra.mxu1 %v2994_v37 }
  0xf5   :  { %v2998_v40 = vpack.c.bf16 %v2574_v38, %v249_v39 }
  0xf7   :  { %v2577_v41 = vpop.f32.mrb[14].mxu0  ;;  %2999 = vmatprep.subr.bf16.mxu1 %v2998_v40 }
  0xf8   :  { %v259_v42 = vpop.f32.mrb[15].mxu0  ;;  %3001 = vmatpush3.bf16.msra.mxu1 %v2998_v40 }
  0xf9   :  { %v3002_v43 = vpack.c.bf16 %v2577_v41, %v259_v42 }
  0xfb   :  { %3003 = vmatprep.subr.bf16.mxu1 %v3002_v43  ;;  %v2640_v44 = vpop.f32.mrb[16].mxu0 }
  0xfc   :  { %3005 = vmatpush3.bf16.msra.mxu1 %v3002_v43  ;;  %v527_v45 = vpop.f32.mrb[17].mxu0 }
  0xfd   :  { %v3010_v47 = vpack.c.bf16 %v2640_v44, %v527_v45 }
  0xff   :  { %2611 = vmatmul.mubr.f32.vlgmr.msra.gmra.mrb[0].mxu1 %v3683_v46  ;;  %v2643_v49 = vpop.f32.mrb[18].mxu0  ;;  %3011 = vmatprep.subr.bf16.mxu1 %v3010_v47 }
 0x100   :  { %v537_v50 = vpop.f32.mrb[19].mxu0  ;;  %3013 = vmatpush3.bf16.msra.mxu1 %v3010_v47  ;;  %2613 = vmatprep.mubr.f32.mxu1 %v3688_v48 }
 0x101   :  { %v3014_v52 = vpack.c.bf16 %v2643_v49, %v537_v50 }
 0x103   :  { %2614 = vmatmul.mubr.f32.gmra.mrb[2].mxu1 %v3695_v51  ;;  %v2646_v54 = vpop.f32.mrb[20].mxu0  ;;  %3015 = vmatprep.subr.bf16.mxu1 %v3014_v52 }
 0x104   :  { %v547_v55 = vpop.f32.mrb[21].mxu0  ;;  %3017 = vmatpush3.bf16.msra.mxu1 %v3014_v52  ;;  %2616 = vmatprep.mubr.f32.mxu1 %v3700_v53 }
 0x105   :  { %v3018_v57 = vpack.c.bf16 %v2646_v54, %v547_v55 }
 0x107   :  { %2617 = vmatmul.mubr.f32.gmra.mrb[4].mxu1 %v3707_v56  ;;  %v2649_v59 = vpop.f32.mrb[22].mxu0  ;;  %3019 = vmatprep.subr.bf16.mxu1 %v3018_v57 }
 0x108   :  { %v557_v60 = vpop.f32.mrb[23].mxu0  ;;  %3021 = vmatpush3.bf16.msra.mxu1 %v3018_v57  ;;  %2619 = vmatprep.mubr.f32.mxu1 %v3712_v58 }
 0x109   :  { %v3022_v62 = vpack.c.bf16 %v2649_v59, %v557_v60 }
 0x10b   :  { %2620 = vmatmul.mubr.f32.gmra.mrb[6].mxu1 %v3719_v61  ;;  %v2652_v0 = vpop.f32.mrb[24].mxu0  ;;  %3023 = vmatprep.subr.bf16.mxu1 %v3022_v62 }
 0x10c   :  { %v567_v1 = vpop.f32.mrb[25].mxu0  ;;  %3025 = vmatpush3.bf16.msra.mxu1 %v3022_v62  ;;  %2622 = vmatprep.mubr.f32.mxu1 %v3724_v63 }
 0x10d   :  { %v3026_v4 = vpack.c.bf16 %v2652_v0, %v567_v1 }
 0x10f   :  { %2623 = vmatmul.mubr.f32.gmra.mrb[8].mxu1 %v3731_v2  ;;  %v2655_v8 = vpop.f32.mrb[26].mxu0  ;;  %3027 = vmatprep.subr.bf16.mxu1 %v3026_v4 }
 0x110   :  { %v577_v9 = vpop.f32.mrb[27].mxu0  ;;  %3029 = vmatpush3.bf16.msra.mxu1 %v3026_v4  ;;  %2625 = vmatprep.mubr.f32.mxu1 %v3736_v7 }
 0x111   :  { %v3030_v5 = vpack.c.bf16 %v2655_v8, %v577_v9 }
 0x113   :  { %2626 = vmatmul.mubr.f32.gmra.mrb[10].mxu1 %v3743_v10  ;;  %v2658_v12 = vpop.f32.mrb[28].mxu0  ;;  %3031 = vmatprep.subr.bf16.mxu1 %v3030_v5 }
 0x114   :  { %v587_v3 = vpop.f32.mrb[29].mxu0  ;;  %3033 = vmatpush3.bf16.msra.mxu1 %v3030_v5  ;;  %2628 = vmatprep.mubr.f32.mxu1 %v3748_v11 }
 0x115   :  { %v3034_v15 = vpack.c.bf16 %v2658_v12, %v587_v3 }
 0x117   :  { %2629 = vmatmul.mubr.f32.gmra.mrb[12].mxu1 %v3755_v13  ;;  %v2661_v17 = vpop.f32.mrb[30].mxu0  ;;  %3035 = vmatprep.subr.bf16.mxu1 %v3034_v15 }
 0x118   :  { %v597_v18 = vpop.f32.mrb[31].mxu0  ;;  %3037 = vmatpush3.bf16.msra.mxu1 %v3034_v15  ;;  %2631 = vmatprep.mubr.f32.mxu1 %v3760_v16 }
 0x119   :  { %v3038_v23 = vpack.c.bf16 %v2661_v17, %v597_v18 }
 0x11b   :  { %2632 = vmatmul.mubr.f32.gmra.mrb[14].mxu1 %v3767_v21  ;;  %3039 = vmatprep.subr.bf16.mxu1 %v3038_v23  ;;  %v2724_v6 = vpop.f32.mrb[32].mxu0 }
 0x11c   :  { %3041 = vmatpush3.bf16.msra.mxu1 %v3038_v23  ;;  %v929_v14 = vpop.f32.mrb[33].mxu0  ;;  %2694 = vmatprep.mubr.f32.mxu1 %v3639_v22 }
 0x11d   :  { %v3046_v19 = vpack.c.bf16 %v2724_v6, %v929_v14 }
 0x11f   :  { %2695 = vmatmul.mubr.f32.vlgmr.msra.gmra.mrb[16].mxu1 %v3683_v46  ;;  %v2727_v20 = vpop.f32.mrb[34].mxu0  ;;  %3047 = vmatprep.subr.bf16.mxu1 %v3046_v19 }
 0x120   :  { %v939_v24 = vpop.f32.mrb[35].mxu0  ;;  %3049 = vmatpush3.bf16.msra.mxu1 %v3046_v19  ;;  %2697 = vmatprep.mubr.f32.mxu1 %v3688_v48 }
 0x121   :  { %v3050_v25 = vpack.c.bf16 %v2727_v20, %v939_v24 }
 0x123   :  { %2698 = vmatmul.mubr.f32.gmra.mrb[18].mxu1 %v3695_v51  ;;  %v2730_v26 = vpop.f32.mrb[36].mxu0  ;;  %3051 = vmatprep.subr.bf16.mxu1 %v3050_v25 }
 0x124   :  { %v949_v27 = vpop.f32.mrb[37].mxu0  ;;  %3053 = vmatpush3.bf16.msra.mxu1 %v3050_v25  ;;  %2700 = vmatprep.mubr.f32.mxu1 %v3700_v53 }
 0x125   :  { %v3054_v28 = vpack.c.bf16 %v2730_v26, %v949_v27 }
 0x127   :  { %2701 = vmatmul.mubr.f32.gmra.mrb[20].mxu1 %v3707_v56  ;;  %v2733_v29 = vpop.f32.mrb[38].mxu0  ;;  %3055 = vmatprep.subr.bf16.mxu1 %v3054_v28 }
 0x128   :  { %v959_v30 = vpop.f32.mrb[39].mxu0  ;;  %3057 = vmatpush3.bf16.msra.mxu1 %v3054_v28  ;;  %2703 = vmatprep.mubr.f32.mxu1 %v3712_v58 }
 0x129   :  { %v3058_v31 = vpack.c.bf16 %v2733_v29, %v959_v30 }
 0x12b   :  { %2704 = vmatmul.mubr.f32.gmra.mrb[22].mxu1 %v3719_v61  ;;  %v2736_v32 = vpop.f32.mrb[40].mxu0  ;;  %3059 = vmatprep.subr.bf16.mxu1 %v3058_v31 }
 0x12c   :  { %v969_v33 = vpop.f32.mrb[41].mxu0  ;;  %3061 = vmatpush3.bf16.msra.mxu1 %v3058_v31  ;;  %2706 = vmatprep.mubr.f32.mxu1 %v3724_v63 }
 0x12d   :  { %v3062_v34 = vpack.c.bf16 %v2736_v32, %v969_v33 }
 0x12f   :  { %2707 = vmatmul.mubr.f32.gmra.mrb[24].mxu1 %v3731_v2  ;;  %v2739_v35 = vpop.f32.mrb[42].mxu0  ;;  %3063 = vmatprep.subr.bf16.mxu1 %v3062_v34 }
 0x130   :  { %v979_v36 = vpop.f32.mrb[43].mxu0  ;;  %3065 = vmatpush3.bf16.msra.mxu1 %v3062_v34  ;;  %2709 = vmatprep.mubr.f32.mxu1 %v3736_v7 }
 0x131   :  { %v3066_v37 = vpack.c.bf16 %v2739_v35, %v979_v36 }
 0x133   :  { %2710 = vmatmul.mubr.f32.gmra.mrb[26].mxu1 %v3743_v10  ;;  %v2742_v38 = vpop.f32.mrb[44].mxu0  ;;  %3067 = vmatprep.subr.bf16.mxu1 %v3066_v37 }
 0x134   :  { %v989_v39 = vpop.f32.mrb[45].mxu0  ;;  %3069 = vmatpush3.bf16.msra.mxu1 %v3066_v37  ;;  %2712 = vmatprep.mubr.f32.mxu1 %v3748_v11 }
 0x135   :  { %v3070_v40 = vpack.c.bf16 %v2742_v38, %v989_v39 }
 0x137   :  { %2713 = vmatmul.mubr.f32.gmra.mrb[28].mxu1 %v3755_v13  ;;  %v2745_v41 = vpop.f32.mrb[46].mxu0  ;;  %3071 = vmatprep.subr.bf16.mxu1 %v3070_v40 }
 0x138   :  { %v999_v42 = vpop.f32.mrb[47].mxu0  ;;  %3073 = vmatpush3.bf16.msra.mxu1 %v3070_v40  ;;  %2715 = vmatprep.mubr.f32.mxu1 %v3760_v16 }
 0x139   :  { %v3074_v43 = vpack.c.bf16 %v2745_v41, %v999_v42 }
 0x13b   :  { %2716 = vmatmul.mubr.f32.gmra.mrb[30].mxu1 %v3767_v21  ;;  %3075 = vmatprep.subr.bf16.mxu1 %v3074_v43  ;;  %v2808_v44 = vpop.f32.mrb[48].mxu0 }
 0x13c   :  { %3077 = vmatpush3.bf16.msra.mxu1 %v3074_v43  ;;  %v1299_v45 = vpop.f32.mrb[49].mxu0  ;;  %2778 = vmatprep.mubr.f32.mxu1 %v3639_v22 }
 0x13d   :  { %v3082_v47 = vpack.c.bf16 %v2808_v44, %v1299_v45 }
 0x13f   :  { %2779 = vmatmul.mubr.f32.vlgmr.msra.gmra.mrb[32].mxu1 %v3683_v46  ;;  %v2811_v49 = vpop.f32.mrb[50].mxu0  ;;  %3083 = vmatprep.subr.bf16.mxu1 %v3082_v47 }
 0x140   :  { %v1309_v50 = vpop.f32.mrb[51].mxu0  ;;  %3085 = vmatpush3.bf16.msra.mxu1 %v3082_v47  ;;  %2781 = vmatprep.mubr.f32.mxu1 %v3688_v48 }
 0x141   :  { %v3086_v52 = vpack.c.bf16 %v2811_v49, %v1309_v50 }
 0x143   :  { %2782 = vmatmul.mubr.f32.gmra.mrb[34].mxu1 %v3695_v51  ;;  %v2814_v54 = vpop.f32.mrb[52].mxu0  ;;  %3087 = vmatprep.subr.bf16.mxu1 %v3086_v52 }
 0x144   :  { %v1319_v55 = vpop.f32.mrb[53].mxu0  ;;  %3089 = vmatpush3.bf16.msra.mxu1 %v3086_v52  ;;  %2784 = vmatprep.mubr.f32.mxu1 %v3700_v53 }
 0x145   :  { %v3090_v57 = vpack.c.bf16 %v2814_v54, %v1319_v55 }
 0x147   :  { %2785 = vmatmul.mubr.f32.gmra.mrb[36].mxu1 %v3707_v56  ;;  %v2817_v59 = vpop.f32.mrb[54].mxu0  ;;  %3091 = vmatprep.subr.bf16.mxu1 %v3090_v57 }
 0x148   :  { %v1329_v60 = vpop.f32.mrb[55].mxu0  ;;  %3093 = vmatpush3.bf16.msra.mxu1 %v3090_v57  ;;  %2787 = vmatprep.mubr.f32.mxu1 %v3712_v58 }
 0x149   :  { %v3094_v62 = vpack.c.bf16 %v2817_v59, %v1329_v60 }
 0x14b   :  { %2788 = vmatmul.mubr.f32.gmra.mrb[38].mxu1 %v3719_v61  ;;  %v2820_v0 = vpop.f32.mrb[56].mxu0  ;;  %3095 = vmatprep.subr.bf16.mxu1 %v3094_v62 }
 0x14c   :  { %v1339_v1 = vpop.f32.mrb[57].mxu0  ;;  %3097 = vmatpush3.bf16.msra.mxu1 %v3094_v62  ;;  %2790 = vmatprep.mubr.f32.mxu1 %v3724_v63 }
 0x14d   :  { %v3098_v4 = vpack.c.bf16 %v2820_v0, %v1339_v1 }
 0x14f   :  { %2791 = vmatmul.mubr.f32.gmra.mrb[40].mxu1 %v3731_v2  ;;  %v2823_v8 = vpop.f32.mrb[58].mxu0  ;;  %3099 = vmatprep.subr.bf16.mxu1 %v3098_v4 }
 0x150   :  { %v1349_v9 = vpop.f32.mrb[59].mxu0  ;;  %3101 = vmatpush3.bf16.msra.mxu1 %v3098_v4  ;;  %2793 = vmatprep.mubr.f32.mxu1 %v3736_v7 }
 0x151   :  { %v3102_v5 = vpack.c.bf16 %v2823_v8, %v1349_v9 }
 0x153   :  { %2794 = vmatmul.mubr.f32.gmra.mrb[42].mxu1 %v3743_v10  ;;  %v2826_v12 = vpop.f32.mrb[60].mxu0  ;;  %3103 = vmatprep.subr.bf16.mxu1 %v3102_v5 }
 0x154   :  { %v1359_v3 = vpop.f32.mrb[61].mxu0  ;;  %3105 = vmatpush3.bf16.msra.mxu1 %v3102_v5  ;;  %2796 = vmatprep.mubr.f32.mxu1 %v3748_v11 }
 0x155   :  { %v3106_v15 = vpack.c.bf16 %v2826_v12, %v1359_v3 }
 0x157   :  { %2797 = vmatmul.mubr.f32.gmra.mrb[44].mxu1 %v3755_v13  ;;  %v2829_v17 = vpop.f32.mrb[62].mxu0  ;;  %3107 = vmatprep.subr.bf16.mxu1 %v3106_v15 }
 0x158   :  { %v1369_v18 = vpop.f32.mrb[63].mxu0  ;;  %3109 = vmatpush3.bf16.msra.mxu1 %v3106_v15  ;;  %2799 = vmatprep.mubr.f32.mxu1 %v3760_v16 }
 0x159   :  { %v3110_v23 = vpack.c.bf16 %v2829_v17, %v1369_v18 }
 0x15b   :  { %2800 = vmatmul.mubr.f32.gmra.mrb[46].mxu1 %v3767_v21  ;;  %3111 = vmatprep.subr.bf16.mxu1 %v3110_v23  ;;  %v2892_v6 = vpop.f32.mrb[64].mxu0 }
 0x15c   :  { %3113 = vmatpush3.bf16.msra.mxu1 %v3110_v23  ;;  %v1669_v14 = vpop.f32.mrb[65].mxu0  ;;  %2862 = vmatprep.mubr.f32.mxu1 %v3639_v22 }
 0x15d   :  { %v3118_v19 = vpack.c.bf16 %v2892_v6, %v1669_v14 }
 0x15f   :  { %2863 = vmatmul.mubr.f32.vlgmr.msra.gmra.mrb[48].mxu1 %v3683_v46  ;;  %v2895_v20 = vpop.f32.mrb[66].mxu0  ;;  %3119 = vmatprep.subr.bf16.mxu0 %v3118_v19 }
 0x160   :  { %3150 = vmatprep.subr.bf16.mxu1 %v3118_v19  ;;  %v1679_v24 = vpop.f32.mrb[67].mxu0  ;;  %3121 = vmatpush3.bf16.msra.mxu0 %v3118_v19 }
 0x161   :  { %v3122_v25 = vpack.c.bf16 %v2895_v20, %v1679_v24  ;;  %3158 = vmatpush3.bf16.msra.mxu1 %v3118_v19  ;;  %2865 = vmatprep.mubr.f32.mxu1 %v3688_v48 }
 0x163   :  { %2866 = vmatmul.mubr.f32.gmra.mrb[50].mxu1 %v3695_v51  ;;  %v2898_v26 = vpop.f32.mrb[68].mxu0  ;;  %3123 = vmatprep.subr.bf16.mxu0 %v3122_v25 }
 0x164   :  { %3151 = vmatprep.subr.bf16.mxu1 %v3122_v25  ;;  %v1689_v27 = vpop.f32.mrb[69].mxu0  ;;  %3125 = vmatpush3.bf16.msra.mxu0 %v3122_v25 }
 0x165   :  { %v3126_v22 = vpack.c.bf16 %v2898_v26, %v1689_v27  ;;  %3159 = vmatpush3.bf16.msra.mxu1 %v3122_v25  ;;  %2868 = vmatprep.mubr.f32.mxu1 %v3700_v53 }
 0x167   :  { %2869 = vmatmul.mubr.f32.gmra.mrb[52].mxu1 %v3707_v56  ;;  %v2901_v28 = vpop.f32.mrb[70].mxu0  ;;  %3127 = vmatprep.subr.bf16.mxu0 %v3126_v22 }
 0x168   :  { %3152 = vmatprep.subr.bf16.mxu1 %v3126_v22  ;;  %v1699_v29 = vpop.f32.mrb[71].mxu0  ;;  %3129 = vmatpush3.bf16.msra.mxu0 %v3126_v22 }
 0x169   :  { %v3130_v30 = vpack.c.bf16 %v2901_v28, %v1699_v29  ;;  %3160 = vmatpush3.bf16.msra.mxu1 %v3126_v22  ;;  %2871 = vmatprep.mubr.f32.mxu1 %v3712_v58 }
 0x16b   :  { %2872 = vmatmul.mubr.f32.gmra.mrb[54].mxu1 %v3719_v61  ;;  %v2904_v31 = vpop.f32.mrb[72].mxu0  ;;  %3131 = vmatprep.subr.bf16.mxu0 %v3130_v30 }
 0x16c   :  { %3153 = vmatprep.subr.bf16.mxu1 %v3130_v30  ;;  %v1709_v32 = vpop.f32.mrb[73].mxu0  ;;  %3133 = vmatpush3.bf16.msra.mxu0 %v3130_v30 }
 0x16d   :  { %v3134_v33 = vpack.c.bf16 %v2904_v31, %v1709_v32  ;;  %3161 = vmatpush3.bf16.msra.mxu1 %v3130_v30  ;;  %2874 = vmatprep.mubr.f32.mxu1 %v3724_v63 }
 0x16f   :  { %2875 = vmatmul.mubr.f32.gmra.mrb[56].mxu1 %v3731_v2  ;;  %v2907_v34 = vpop.f32.mrb[74].mxu0  ;;  %3135 = vmatprep.subr.bf16.mxu0 %v3134_v33 }
 0x170   :  { %3154 = vmatprep.subr.bf16.mxu1 %v3134_v33  ;;  %v1719_v35 = vpop.f32.mrb[75].mxu0  ;;  %3137 = vmatpush3.bf16.msra.mxu0 %v3134_v33 }
 0x171   :  { %v3138_v36 = vpack.c.bf16 %v2907_v34, %v1719_v35  ;;  %3162 = vmatpush3.bf16.msra.mxu1 %v3134_v33  ;;  %2877 = vmatprep.mubr.f32.mxu1 %v3736_v7 }
 0x173   :  { %2878 = vmatmul.mubr.f32.gmra.mrb[58].mxu1 %v3743_v10  ;;  %v2910_v37 = vpop.f32.mrb[76].mxu0  ;;  %3139 = vmatprep.subr.bf16.mxu0 %v3138_v36 }
 0x174   :  { %3155 = vmatprep.subr.bf16.mxu1 %v3138_v36  ;;  %v1729_v38 = vpop.f32.mrb[77].mxu0  ;;  %3141 = vmatpush3.bf16.msra.mxu0 %v3138_v36 }
 0x175   :  { %v3142_v39 = vpack.c.bf16 %v2910_v37, %v1729_v38  ;;  %3163 = vmatpush3.bf16.msra.mxu1 %v3138_v36  ;;  %2880 = vmatprep.mubr.f32.mxu1 %v3748_v11 }
 0x177   :  { %2881 = vmatmul.mubr.f32.gmra.mrb[60].mxu1 %v3755_v13  ;;  %v2913_v40 = vpop.f32.mrb[78].mxu0  ;;  %3143 = vmatprep.subr.bf16.mxu0 %v3142_v39 }
 0x178   :  { %3156 = vmatprep.subr.bf16.mxu1 %v3142_v39  ;;  %v1739_v41 = vpop.f32.mrb[79].mxu0  ;;  %3145 = vmatpush3.bf16.msra.mxu0 %v3142_v39 }
 0x179   :  { %v3146_v42 = vpack.c.bf16 %v2913_v40, %v1739_v41  ;;  %3164 = vmatpush3.bf16.msra.mxu1 %v3142_v39  ;;  %2883 = vmatprep.mubr.f32.mxu1 %v3760_v16 }
 0x17b   :  { %2884 = vmatmul.mubr.f32.gmra.mrb[62].mxu1 %v3767_v21  ;;  %3147 = vmatprep.subr.bf16.mxu0 %v3146_v42 }
 0x17c   :  { %3157 = vmatprep.subr.bf16.mxu1 %v3146_v42  ;;  %3149 = vmatpush3.bf16.msra.mxu0 %v3146_v42 }
 0x17d   :  { %3165 = vmatpush3.bf16.msra.mxu1 %v3146_v42  ;;  %2955 = vmatprep.mubr.f32.mxu1 %v3712_v58 }
 0x17f   :  { %2947 = vmatmul.mubr.f32.vlgmr.msra.gmra.mrb[80].mxu0 %v3683_v46 }
 0x180   :  { %2956 = vmatmul.mubr.f32.vlgmr.msra.gmra.mrb[64].mxu1 %v3719_v61  ;;  %2949 = vmatprep.mubr.f32.mxu0 %v3688_v48 }
 0x181   :  { %2958 = vmatprep.mubr.f32.mxu1 %v3724_v63 }
 0x183   :  { %2950 = vmatmul.mubr.f32.gmra.mrb[82].mxu0 %v3695_v51 }
 0x184   :  { %2959 = vmatmul.mubr.f32.gmra.mrb[66].mxu1 %v3731_v2  ;;  %2952 = vmatprep.mubr.f32.mxu0 %v3700_v53 }
 0x185   :  { %2961 = vmatprep.mubr.f32.mxu1 %v3736_v7 }
 0x187   :  { %2953 = vmatmul.mubr.f32.gmra.mrb[84].mxu0 %v3707_v56 }
 0x188   :  { %2962 = vmatmul.mubr.f32.gmra.mrb[68].mxu1 %v3743_v10 }
 0x189   :  { %2964 = vmatprep.mubr.f32.mxu1 %v3748_v11 }
 0x18c   :  { %2965 = vmatmul.mubr.f32.gmra.mrb[70].mxu1 %v3755_v13 }
 0x18d   :  { %2967 = vmatprep.mubr.f32.mxu1 %v3760_v16 }
 0x190   :  { %2968 = vmatmul.mubr.f32.gmra.mrb[72].mxu1 %v3767_v21 }
 0x1d2   :  { %v2612_v46 = vpop.f32.mrb[0].mxu1 }
 0x1d3   :  { %v334_v48 = vpop.f32.mrb[1].mxu1  ;;  %v3841_v45 = vmul.f32 %v2612_v46, %v2612_v46 }
 0x1d4   :  { %v3847_v52 = vmul.f32 %v334_v48, %v334_v48 }
 0x1d6   :  { %v2615_v51 = vpop.f32.mrb[2].mxu1 }
 0x1d7   :  { %v344_v58 = vpop.f32.mrb[3].mxu1  ;;  %v3861_v62 = vmul.f32 %v2615_v51, %v2615_v51 }
 0x1d8   :  { %v3867_v8 = vmul.f32 %v344_v58, %v344_v58 }
 0x1da   :  { %v2618_v61 = vpop.f32.mrb[4].mxu1 }
 0x1db   :  { %v354_v53 = vpop.f32.mrb[5].mxu1  ;;  %v3881_v17 = vmul.f32 %v2618_v61, %v2618_v61 }
 0x1dc   :  { %v3887_v14 = vmul.f32 %v354_v53, %v354_v53 }
 0x1de   :  { %v2621_v63 = vpop.f32.mrb[6].mxu1 }
 0x1df   :  { %v364_v2 = vpop.f32.mrb[7].mxu1  ;;  %v3901_v27 = vmul.f32 %v2621_v63, %v2621_v63 }
 0x1e0   :  { %v3907_v30 = vmul.f32 %v364_v2, %v364_v2 }
 0x1e2   :  { %v2624_v7 = vpop.f32.mrb[8].mxu1 }
 0x1e3   :  { %v374_v56 = vpop.f32.mrb[9].mxu1  ;;  %v3921_v36 = vmul.f32 %v2624_v7, %v2624_v7 }
 0x1e4   :  { %v3927_v40 = vmul.f32 %v374_v56, %v374_v56 }
 0x1e6   :  { %v2627_v43 = vpop.f32.mrb[10].mxu1 }
 0x1e7   :  { %v384_v10 = vpop.f32.mrb[11].mxu1 }
 0x1ea   :  { %v3833_v44 = vpop.f32.mrb[12].mxu1 }
 0x1eb   :  { %v3835_v11 = vpop.f32.mrb[13].mxu1 }
 0x1ee   :  { %v3837_v13 = vpop.f32.mrb[14].mxu1 }
 0x1ef   :  { %v3839_v16 = vpop.f32.mrb[15].mxu1 }
 0x1f2   :  { %v2696_v21 = vpop.f32.mrb[16].mxu1 }
 0x1f3   :  { %v3843_v47 = vmul.f32 %v2696_v21, %v2696_v21  ;;  %v3845_v49 = vmul.f32 %v2696_v21, %v2612_v46  ;;  %v672_v50 = vpop.f32.mrb[17].mxu1 }
 0x1f4   :  { %v3849_v54 = vmul.f32 %v672_v50, %v672_v50  ;;  %v3851_v55 = vmul.f32 %v672_v50, %v334_v48 }
 0x1f5   :  { %v3855_v57 = vadd.f32 %v3843_v47, %v3841_v45 }
 0x1f6   :  { %v3859_v59 = vadd.f32 %v3849_v54, %v3847_v52  ;;  %v2699_v60 = vpop.f32.mrb[18].mxu1 }
 0x1f7   :  { %v3863_v0 = vmul.f32 %v2699_v60, %v2699_v60  ;;  %v3865_v1 = vmul.f32 %v2699_v60, %v2615_v51  ;;  %v682_v4 = vpop.f32.mrb[19].mxu1 }
 0x1f8   :  { %v3869_v9 = vmul.f32 %v682_v4, %v682_v4  ;;  %v3871_v5 = vmul.f32 %v682_v4, %v344_v58  ;;  %v3941_v58 = vmul.f32 %v2627_v43, %v2627_v43 }
 0x1f9   :  { %v3875_v12 = vadd.f32 %v3863_v0, %v3861_v62 }
 0x1fa   :  { %v3879_v3 = vadd.f32 %v3869_v9, %v3867_v8  ;;  %v2702_v15 = vpop.f32.mrb[20].mxu1  ;;  %4292 = vst [vmem:[#allocation6_spill] sm:$0xff] %v3941_v58 }
 0x1fb   :  { %v3883_v18 = vmul.f32 %v2702_v15, %v2702_v15  ;;  %v3885_v23 = vmul.f32 %v2702_v15, %v2618_v61  ;;  %v692_v6 = vpop.f32.mrb[21].mxu1 }
 0x1fc   :  { %v3889_v19 = vmul.f32 %v692_v6, %v692_v6  ;;  %v3891_v20 = vmul.f32 %v692_v6, %v354_v53  ;;  %v3972_v6 = vmul.f32 %v3835_v11, %v3835_v11 }
 0x1fd   :  { %v3895_v24 = vadd.f32 %v3883_v18, %v3881_v17 }
 0x1fe   :  { %v3899_v25 = vadd.f32 %v3889_v19, %v3887_v14  ;;  %v2705_v26 = vpop.f32.mrb[22].mxu1  ;;  %4299 = vst [vmem:[#allocation13_spill] sm:$0xff] %v3972_v6 }
 0x1ff   :  { %v3903_v22 = vmul.f32 %v2705_v26, %v2705_v26  ;;  %v3905_v28 = vmul.f32 %v2705_v26, %v2621_v63  ;;  %v702_v29 = vpop.f32.mrb[23].mxu1 }
 0x200   :  { %v3909_v31 = vmul.f32 %v702_v29, %v702_v29  ;;  %v3911_v32 = vmul.f32 %v702_v29, %v364_v2  ;;  %v3947_v2 = vmul.f32 %v384_v10, %v384_v10 }
 0x201   :  { %v3915_v33 = vadd.f32 %v3903_v22, %v3901_v27 }
 0x202   :  { %v3919_v34 = vadd.f32 %v3909_v31, %v3907_v30  ;;  %v2708_v35 = vpop.f32.mrb[24].mxu1  ;;  %4293 = vst [vmem:[#allocation7_spill] sm:$0xff] %v3947_v2 }
 0x203   :  { %v3923_v37 = vmul.f32 %v2708_v35, %v2708_v35  ;;  %v3925_v38 = vmul.f32 %v2708_v35, %v2624_v7  ;;  %v712_v39 = vpop.f32.mrb[25].mxu1 }
 0x204   :  { %v3929_v41 = vmul.f32 %v712_v39, %v712_v39  ;;  %v3931_v42 = vmul.f32 %v712_v39, %v374_v56 }
 0x205   :  { %v3935_v46 = vadd.f32 %v3923_v37, %v3921_v36 }
 0x206   :  { %v3939_v48 = vadd.f32 %v3929_v41, %v3927_v40  ;;  %v2711_v51 = vpop.f32.mrb[26].mxu1 }
 0x207   :  { %v3943_v61 = vmul.f32 %v2711_v51, %v2711_v51  ;;  %v3945_v53 = vmul.f32 %v2711_v51, %v2627_v43  ;;  %v722_v63 = vpop.f32.mrb[27].mxu1  ;;  %v3963_v43 = vmul.f32 %v3833_v44, %v3833_v44  ;;  %v3989_v51 = vmul.f32 %v3837_v13, %v3837_v13 }
 0x208   :  { %v3949_v7 = vmul.f32 %v722_v63, %v722_v63  ;;  %v3951_v56 = vmul.f32 %v722_v63, %v384_v10 }
 0x209   :  { %v3955_v21 = vadd.f32 %v3943_v61, %v3941_v58  ;;  %4297 = vst [vmem:[#allocation11_spill] sm:$0xff] %v3963_v43  ;;  %4304 = vst [vmem:[#allocation18_spill] sm:$0xff] %v3989_v51 }
 0x20a   :  { %4294 = vst [vmem:[#allocation8_spill] sm:$0xff] %v3949_v7  ;;  %v3959_v50 = vadd.f32 %v3949_v7, %v3947_v2  ;;  %v2714_v60 = vpop.f32.mrb[28].mxu1 }
 0x20b   :  { %4295 = vst [vmem:[#allocation9_spill] sm:$0xff] %v3955_v21  ;;  %v3965_v4 = vmul.f32 %v2714_v60, %v2714_v60  ;;  %v3968_v15 = vmul.f32 %v2714_v60, %v3833_v44  ;;  %v732_v10 = vpop.f32.mrb[29].mxu1 }
 0x20c   :  { %4296 = vst [vmem:[#allocation10_spill] sm:$0xff] %v3959_v50  ;;  %v3974_v26 = vmul.f32 %v732_v10, %v732_v10  ;;  %v3977_v29 = vmul.f32 %v732_v10, %v3835_v11  ;;  %v3998_v10 = vmul.f32 %v3839_v16, %v3839_v16 }
 0x20d   :  { %4298 = vst [vmem:[#allocation12_spill] sm:$0xff] %v3965_v4  ;;  %v3981_v35 = vadd.f32 %v3965_v4, %v3963_v43  ;;  %v1910_v43 = vmul.f32 2.0, %v3845_v49 }
 0x20e   :  { %4300 = vst [vmem:[#allocation14_spill] sm:$0xff] %v3974_v26  ;;  %4301 = vst [vmem:[#allocation15_spill] sm:$0xff] %v3977_v29  ;;  %v3985_v39 = vadd.f32 %v3974_v26, %v3972_v6  ;;  %v2717_v44 = vpop.f32.mrb[30].mxu1 }
 0x20f   :  { %4302 = vst [vmem:[#allocation16_spill] sm:$0xff] %v3981_v35  ;;  %v3991_v63 = vmul.f32 %v2717_v44, %v2717_v44  ;;  %v3994_v60 = vmul.f32 %v2717_v44, %v3837_v13  ;;  %v742_v11 = vpop.f32.mrb[31].mxu1  ;;  %4307 = vst [vmem:[#allocation21_spill] sm:$0xff] %v3998_v10 }
 0x210   :  { %4303 = vst [vmem:[#allocation17_spill] sm:$0xff] %v3985_v39  ;;  %v4000_v35 = vmul.f32 %v742_v11, %v742_v11  ;;  %v4003_v26 = vmul.f32 %v742_v11, %v3839_v16 }
 0x211   :  { %4305 = vst [vmem:[#allocation19_spill] sm:$0xff] %v3991_v63  ;;  %4306 = vst [vmem:[#allocation20_spill] sm:$0xff] %v3994_v60  ;;  %v4007_v39 = vadd.f32 %v3991_v63, %v3989_v51 }
 0x212   :  { %4308 = vst [vmem:[#allocation22_spill] sm:$0xff] %v4000_v35  ;;  %4309 = vst [vmem:[#allocation23_spill] sm:$0xff] %v4003_v26  ;;  %v4011_v50 = vadd.f32 %v4000_v35, %v3998_v10  ;;  %v2780_v13 = vpop.f32.mrb[32].mxu1 }
 0x213   :  { %4310 = vst [vmem:[#allocation24_spill] sm:$0xff] %v4007_v39  ;;  %v1154_v44 = vsub.f32 %v2780_v13, %v3841_v45  ;;  %v1074_v60 = vpop.f32.mrb[33].mxu1 }
 0x214   :  { %4311 = vst [vmem:[#allocation25_spill] sm:$0xff] %v4011_v50  ;;  %v1153_v4 = vsub.f32 %v1074_v60, %v3847_v52  ;;  %v2005_v60 = vadd.f32 0.0001, %v3859_v59 }
 0x216   :  { %v2783_v29 = vpop.f32.mrb[34].mxu1 }
 0x217   :  { %v1156_v21 = vsub.f32 %v2783_v29, %v3861_v62  ;;  %v1084_v7 = vpop.f32.mrb[35].mxu1 }
 0x218   :  { %v1155_v16 = vsub.f32 %v1084_v7, %v3867_v8 }
 0x21a   :  { %v2786_v11 = vpop.f32.mrb[36].mxu1 }
 0x21b   :  { %v1158_v26 = vsub.f32 %v2786_v11, %v3881_v17  ;;  %v1094_v39 = vpop.f32.mrb[37].mxu1 }
 0x21c   :  { %v1157_v63 = vsub.f32 %v1094_v39, %v3887_v14 }
 0x21e   :  { %v4019_v35 = vpop.f32.mrb[38].mxu1 }
 0x21f   :  { %v4023_v13 = vpop.f32.mrb[39].mxu1 }
 0x222   :  { %v4027_v62 = vpop.f32.mrb[40].mxu1 }
 0x223   :  { %v4031_v7 = vpop.f32.mrb[41].mxu1 }
 0x226   :  { %v4035_v14 = vpop.f32.mrb[42].mxu1 }
 0x227   :  { %4312 = vst [vmem:[#allocation26_spill] sm:$0xff] %v4035_v14  ;;  %v4039_v39 = vpop.f32.mrb[43].mxu1 }
 0x228   :  { %4313 = vst [vmem:[#allocation27_spill] sm:$0xff] %v4039_v39 }
 0x22a   :  { %v4043_v11 = vpop.f32.mrb[44].mxu1 }
 0x22b   :  { %4314 = vst [vmem:[#allocation28_spill] sm:$0xff] %v4043_v11  ;;  %v4047_v52 = vpop.f32.mrb[45].mxu1 }
 0x22c   :  { %4315 = vst [vmem:[#allocation29_spill] sm:$0xff] %v4047_v52  ;;  %v2006_v52 = vadd.f32 0.0001, %v3855_v57  ;;  %v1911_v57 = vmul.f32 2.0, %v3871_v5 }
 0x22e   :  { %v4051_v45 = vpop.f32.mrb[46].mxu1 }
 0x22f   :  { %4316 = vst [vmem:[#allocation30_spill] sm:$0xff] %v4051_v45  ;;  %v4055_v50 = vpop.f32.mrb[47].mxu1  ;;  %v1909_v45 = vmul.f32 2.0, %v3851_v55 }
 0x232   :  { %v2864_v2 = vpop.f32.mrb[48].mxu1 }
 0x233   :  { %v1524_v39 = vsub.f32 %v2864_v2, %v3843_v47  ;;  %v1444_v58 = vpop.f32.mrb[49].mxu1  ;;  %v4067_v2 = vadd.f32 0.0001, %v1910_v43  ;;  %v2007_v43 = vadd.f32 0.0001, %v3879_v3 }
 0x234   :  { %v1523_v8 = vsub.f32 %v1444_v58, %v3849_v54  ;;  %v2010_v3 = vadd.f32 0.0001, %v3895_v24  ;;  %v4317_v24 = vsub.f32 %v4019_v35, %v3901_v27  ;;  %v2011_v27 = vadd.f32 0.0001, %v3919_v34 }
 0x235   :  { %v2022_v11 = vadd.f32 %v1524_v39, %v1154_v44  ;;  %v4320_v34 = vsub.f32 %v4031_v7, %v3927_v40 }
 0x236   :  { %v2021_v17 = vadd.f32 %v1523_v8, %v1153_v4  ;;  %v2867_v6 = vpop.f32.mrb[50].mxu1  ;;  %v1912_v4 = vmul.f32 2.0, %v3865_v1  ;;  %v2008_v8 = vadd.f32 0.0001, %v3875_v12  ;;  %v4087_v12 = vadd.f32 0.0001, %v1911_v57 }
 0x237   :  { %v2038_v14 = vadd.f32 0.0009, %v2022_v11  ;;  %v1526_v29 = vsub.f32 %v2867_v6, %v3863_v0  ;;  %v1454_v51 = vpop.f32.mrb[51].mxu1 }
 0x238   :  { %v2037_v10 = vadd.f32 0.0009, %v2021_v17  ;;  %v1525_v47 = vsub.f32 %v1454_v51, %v3869_v9  ;;  %v4077_v9 = vadd.f32 0.0001, %v1909_v45 }
 0x239   :  { %v4069_v54 = vmul.f32 %v2038_v14, %v2006_v52  ;;  %v2024_v58 = vadd.f32 %v1526_v29, %v1156_v21  ;;  %v1914_v52 = vmul.f32 2.0, %v3885_v23  ;;  %v4085_v29 = vadd.f32 0.0001, %v1912_v4 }
 0x23a   :  { %v4073_v44 = vmul.f32 %v2037_v10, %v2005_v60  ;;  %v2023_v0 = vadd.f32 %v1525_v47, %v1155_v16  ;;  %v2870_v6 = vpop.f32.mrb[52].mxu1  ;;  %v1913_v10 = vmul.f32 2.0, %v3891_v20 }
 0x23b   :  { %v2040_v39 = vadd.f32 0.0009, %v2024_v58  ;;  %v1528_v59 = vsub.f32 %v2870_v6, %v3883_v18  ;;  %v1464_v17 = vpop.f32.mrb[53].mxu1  ;;  %v2009_v58 = vadd.f32 0.0001, %v3899_v25  ;;  %3169 = vrcp.f32 %v4069_v54 }
 0x23c   :  { %v2039_v51 = vadd.f32 0.0009, %v2023_v0  ;;  %v1527_v21 = vsub.f32 %v1464_v17, %v3889_v19  ;;  %v1916_v0 = vmul.f32 2.0, %v3905_v28  ;;  %v4096_v4 = vadd.f32 0.0001, %v1914_v52 }
 0x23d   :  { %v4083_v14 = vmul.f32 %v2040_v39, %v2008_v8  ;;  %v2026_v16 = vadd.f32 %v1528_v59, %v1158_v26  ;;  %v4098_v57 = vadd.f32 0.0001, %v1913_v10  ;;  %v1918_v39 = vmul.f32 2.0, %v3925_v38 }
 0x23e   :  { %v4089_v18 = vmul.f32 %v2039_v51, %v2007_v43  ;;  %v2025_v45 = vadd.f32 %v1527_v21, %v1157_v63  ;;  %v2873_v60 = vpop.f32.mrb[54].mxu1  ;;  %v4318_v59 = vsub.f32 %v4023_v13, %v3907_v30  ;;  %v2012_v43 = vadd.f32 0.0001, %v3915_v33 }
 0x23f   :  { %v2042_v11 = vadd.f32 0.0009, %v2026_v16  ;;  %v1530_v19 = vsub.f32 %v2873_v60, %v3903_v22  ;;  %v1474_v47 = vpop.f32.mrb[55].mxu1  ;;  %v1915_v22 = vmul.f32 2.0, %v3911_v32  ;;  %v4114_v10 = vadd.f32 0.0001, %v1916_v0 }
 0x240   :  { %v2041_v6 = vadd.f32 0.0009, %v2025_v45  ;;  %v1529_v26 = vsub.f32 %v1474_v47, %v3909_v31  ;;  %v1917_v45 = vmul.f32 2.0, %v3931_v42  ;;  %v1920_v60 = vmul.f32 2.0, %v3945_v53 }
 0x241   :  { %v4100_v8 = vmul.f32 %v2042_v11, %v2010_v3  ;;  %v2028_v63 = vadd.f32 %v1530_v19, %v4317_v24  ;;  %v4319_v13 = vsub.f32 %v4027_v62, %v3921_v36  ;;  %v4123_v3 = vadd.f32 0.0001, %v1915_v22 }
 0x242   :  { %v4107_v25 = vmul.f32 %v2041_v6, %v2009_v58  ;;  %v2027_v31 = vadd.f32 %v1529_v26, %v4318_v59  ;;  %v2876_v17 = vpop.f32.mrb[56].mxu1  ;;  %v1919_v58 = vmul.f32 2.0, %v3951_v56  ;;  %v2013_v36 = vadd.f32 0.0001, %v3939_v48  ;;  %v4322_v59 = vld [vmem:[#allocation26_spill] sm:$0xff]  ;;  %v4327_v48 = vld [vmem:[#allocation27_spill] sm:$0xff] }
 0x243   :  { %v2044_v51 = vadd.f32 0.0009, %v2028_v63  ;;  %v1532_v21 = vsub.f32 %v2876_v17, %v3923_v37  ;;  %v1484_v52 = vpop.f32.mrb[57].mxu1  ;;  %v4125_v37 = vadd.f32 0.0001, %v1918_v39  ;;  %v1922_v62 = vmul.f32 2.0, %v3968_v15 }
 0x244   :  { %v2043_v35 = vadd.f32 0.0009, %v2027_v31  ;;  %v1531_v16 = vsub.f32 %v1484_v52, %v3929_v41  ;;  %v2014_v41 = vadd.f32 0.0001, %v3935_v46  ;;  %v4321_v63 = vld [vmem:[#allocation8_spill] sm:$0xff]  ;;  %v4323_v46 = vld [vmem:[#allocation6_spill] sm:$0xff]  ;;  %3171 = vrcp.f32 %v4073_v44 }
 0x245   :  { %v2060_v30 = vmul.f32 %v2044_v51, %v2012_v43  ;;  %v2030_v33 = vadd.f32 %v1532_v21, %v4319_v13  ;;  %v4136_v39 = vadd.f32 0.0001, %v1917_v45  ;;  %v4138_v40 = vadd.f32 0.0001, %v1920_v60  ;;  %v4325_v43 = vld [vmem:[#allocation9_spill] sm:$0xff]  ;;  %v4330_v60 = vld [vmem:[#allocation12_spill] sm:$0xff] }
 0x246   :  { %v2059_v11 = vmul.f32 %v2043_v35, %v2011_v27  ;;  %v2029_v19 = vadd.f32 %v1531_v16, %v4320_v34  ;;  %v2879_v47 = vpop.f32.mrb[58].mxu1  ;;  %v4324_v31 = vsub.f32 %v4322_v59, %v4323_v46  ;;  %v2016_v51 = vadd.f32 0.0001, %v4325_v43  ;;  %v4328_v27 = vld [vmem:[#allocation7_spill] sm:$0xff]  ;;  %v4333_v59 = vld [vmem:[#allocation16_spill] sm:$0xff] }
 0x247   :  { %v2046_v0 = vadd.f32 0.0009, %v2030_v33  ;;  %v1534_v6 = vsub.f32 %v2879_v47, %v3943_v61  ;;  %v1494_v26 = vpop.f32.mrb[59].mxu1  ;;  %v4326_v61 = vld [vmem:[#allocation15_spill] sm:$0xff]  ;;  %v4329_v35 = vsub.f32 %v4327_v48, %v4328_v27  ;;  %v4148_v33 = vadd.f32 0.0001, %v1919_v58 }
 0x248   :  { %v2045_v24 = vadd.f32 0.0009, %v2029_v19  ;;  %v1533_v22 = vsub.f32 %v1494_v26, %v4321_v63  ;;  %v1921_v21 = vmul.f32 2.0, %v4326_v61  ;;  %v4331_v47 = vld [vmem:[#allocation10_spill] sm:$0xff]  ;;  %v4335_v46 = vld [vmem:[#allocation11_spill] sm:$0xff]  ;;  %v4337_v48 = vld [vmem:[#allocation29_spill] sm:$0xff]  ;;  %3173 = vrcp.f32 %v4083_v14 }
 0x249   :  { %v2062_v7 = vmul.f32 %v2046_v0, %v2014_v41  ;;  %v2032_v17 = vadd.f32 %v1534_v6, %v4324_v31  ;;  %v2015_v41 = vadd.f32 0.0001, %v4331_v47  ;;  %v4152_v0 = vadd.f32 0.0001, %v1922_v62  ;;  %v4332_v26 = vld [vmem:[#allocation14_spill] sm:$0xff]  ;;  %v4338_v62 = vld [vmem:[#allocation13_spill] sm:$0xff] }
 0x24a   :  { %v2061_v52 = vmul.f32 %v2045_v24, %v2013_v36  ;;  %v2031_v16 = vadd.f32 %v1533_v22, %v4329_v35  ;;  %v2882_v13 = vpop.f32.mrb[60].mxu1  ;;  %v2018_v36 = vadd.f32 0.0001, %v4333_v59  ;;  %v4334_v22 = vld [vmem:[#allocation28_spill] sm:$0xff]  ;;  %v4339_v27 = vsub.f32 %v4337_v48, %v4338_v62  ;;  %v4345_v59 = vld [vmem:[#allocation30_spill] sm:$0xff] }
 0x24b   :  { %v2048_v45 = vadd.f32 0.0009, %v2032_v17  ;;  %v1536_v34 = vsub.f32 %v2882_v13, %v4330_v60  ;;  %v1504_v19 = vpop.f32.mrb[61].mxu1  ;;  %v4336_v58 = vsub.f32 %v4334_v22, %v4335_v46  ;;  %v4160_v17 = vadd.f32 0.0001, %v1921_v21  ;;  %v4340_v13 = vld [vmem:[#allocation17_spill] sm:$0xff] }
 0x24c   :  { %v2047_v6 = vadd.f32 0.0009, %v2031_v16  ;;  %v1535_v63 = vsub.f32 %v1504_v19, %v4332_v26  ;;  %v2017_v60 = vadd.f32 0.0001, %v4340_v13  ;;  %v4342_v47 = vld [vmem:[#allocation20_spill] sm:$0xff]  ;;  %3175 = vrcp.f32 %v4089_v18  ;;  %v4343_v21 = vld [vmem:[#allocation22_spill] sm:$0xff] }
 0x24d   :  { %v2064_v24 = vmul.f32 %v2048_v45, %v2016_v51  ;;  %v2034_v31 = vadd.f32 %v1536_v34, %v4336_v58  ;;  %v4341_v51 = vld [vmem:[#allocation19_spill] sm:$0xff]  ;;  %v4170_v34 = vmul.f32 2.0, %v4342_v47  ;;  %3177 = vrcp.f32 %v2060_v30  ;;  %v4346_v14 = vld [vmem:[#allocation18_spill] sm:$0xff]  ;;  %v4348_v58 = vld [vmem:[#allocation24_spill] sm:$0xff] }
 0x24e   :  { %v2063_v43 = vmul.f32 %v2047_v6, %v2015_v41  ;;  %v2033_v35 = vadd.f32 %v1535_v63, %v4339_v27  ;;  %v2885_v16 = vpop.f32.mrb[62].mxu1  ;;  %v4344_v6 = vld [vmem:[#allocation23_spill] sm:$0xff]  ;;  %v4347_v22 = vsub.f32 %v4345_v59, %v4346_v14  ;;  %3179 = vrcp.f32 %v2059_v11  ;;  %v4349_v18 = vld [vmem:[#allocation21_spill] sm:$0xff]  ;;  %v3170_v14 = vpop.eup %3169 }
 0x24f   :  { %v2050_v54 = vadd.f32 0.0009, %v2034_v31  ;;  %v1538_v45 = vsub.f32 %v2885_v16, %v4341_v51  ;;  %v1514_v19 = vpop.f32.mrb[63].mxu1  ;;  %v4175_v26 = vmul.f32 2.0, %v4344_v6  ;;  %v2020_v31 = vadd.f32 0.0001, %v4348_v58 }
 0x250   :  { %v2049_v44 = vadd.f32 0.0009, %v2033_v35  ;;  %v1537_v41 = vsub.f32 %v1514_v19, %v4343_v21  ;;  %v4350_v62 = vsub.f32 %v4055_v50, %v4349_v18  ;;  %v4351_v16 = vld [vmem:[#allocation25_spill] sm:$0xff]  ;;  %3181 = vrcp.f32 %v4100_v8 }
 0x251   :  { %v4177_v63 = vmul.f32 %v2050_v54, %v2018_v36  ;;  %v2036_v46 = vadd.f32 %v1538_v45, %v4347_v22  ;;  %v2019_v13 = vadd.f32 0.0001, %v4351_v16  ;;  %3183 = vrcp.f32 %v4107_v25 }
 0x252   :  { %v4183_v48 = vmul.f32 %v2049_v44, %v2017_v60  ;;  %v2035_v27 = vadd.f32 %v1537_v41, %v4350_v62  ;;  %v2948_v35 = vpop.f32.mrb[80].mxu0  ;;  %3185 = vrcp.f32 %v2062_v7  ;;  %v3172_v7 = vpop.eup %3171 }
 0x253   :  { %v2052_v30 = vadd.f32 0.0009, %v2036_v46  ;;  %v1894_v36 = vsub.f32 %v2948_v35, %v3845_v49  ;;  %v2957_v54 = vpop.f32.mrb[64].mxu1  ;;  %v1814_v51 = vpop.f32.mrb[81].mxu0  ;;  %3187 = vrcp.f32 %v2061_v52 }
 0x254   :  { %v2051_v45 = vadd.f32 0.0009, %v2035_v27  ;;  %v1900_v11 = vsub.f32 %v2957_v54, %v3905_v28  ;;  %v1893_v60 = vsub.f32 %v1814_v51, %v3851_v55  ;;  %v1844_v19 = vpop.f32.mrb[65].mxu1  ;;  %3189 = vrcp.f32 %v2064_v24  ;;  %v3174_v18 = vpop.eup %3173 }
 0x255   :  { %v4194_v50 = vmul.f32 %v2052_v30, %v2020_v31  ;;  %v1942_v44 = vmul.f32 2.0, %v1894_v36  ;;  %v1899_v21 = vsub.f32 %v1844_v19, %v3911_v32  ;;  %3191 = vrcp.f32 %v2063_v43 }
 0x256   :  { %v4197_v8 = vmul.f32 %v2051_v45, %v2019_v13  ;;  %v1948_v49 = vmul.f32 2.0, %v1900_v11  ;;  %v1941_v41 = vmul.f32 2.0, %v1893_v60  ;;  %v2951_v59 = vpop.f32.mrb[82].mxu0  ;;  %v3176_v16 = vpop.eup %3175  ;;  %3193 = vrcp.f32 %v4177_v63 }
 0x257   :  { %v1958_v25 = vadd.f32 0.0009, %v1942_v44  ;;  %v1947_v22 = vmul.f32 2.0, %v1899_v21  ;;  %v1896_v28 = vsub.f32 %v2951_v59, %v3865_v1  ;;  %v2960_v55 = vpop.f32.mrb[66].mxu1  ;;  %v1824_v46 = vpop.f32.mrb[83].mxu0  ;;  %3195 = vrcp.f32 %v4183_v48 }
 0x258   :  { %v1964_v58 = vadd.f32 0.0009, %v1948_v49  ;;  %v1957_v31 = vadd.f32 0.0009, %v1941_v41  ;;  %v1902_v32 = vsub.f32 %v2960_v55, %v3925_v38  ;;  %v1854_v52 = vpop.f32.mrb[67].mxu1  ;;  %v1895_v24 = vsub.f32 %v1824_v46, %v3871_v5  ;;  %v3178_v54 = vpop.eup %3177 }
 0x259   :  { %v1974_v62 = vmul.f32 %v1958_v25, %v4067_v2  ;;  %v1963_v27 = vadd.f32 0.0009, %v1947_v22  ;;  %v1944_v35 = vmul.f32 2.0, %v1896_v28  ;;  %v1901_v43 = vsub.f32 %v1854_v52, %v3931_v42  ;;  %v3180_v19 = vpop.eup %3179 }
 0x25a   :  { %v1980_v13 = vmul.f32 %v1964_v58, %v4114_v10  ;;  %v1973_v1 = vmul.f32 %v1957_v31, %v4077_v9  ;;  %v1950_v30 = vmul.f32 2.0, %v1902_v32  ;;  %v2954_v36 = vpop.f32.mrb[84].mxu0  ;;  %v1943_v11 = vmul.f32 2.0, %v1895_v24  ;;  %v3182_v9 = vpop.eup %3181 }
 0x25b   :  { %v2072_v51 = vmul.f32 %v3170_v14, %v1974_v62  ;;  %v1979_v38 = vmul.f32 %v1963_v27, %v4123_v3  ;;  %v1960_v45 = vadd.f32 0.0009, %v1944_v35  ;;  %v2963_v2 = vpop.f32.mrb[68].mxu1  ;;  %v1834_v60 = vpop.f32.mrb[85].mxu0  ;;  %v1949_v10 = vmul.f32 2.0, %v1901_v43 }
 0x25c   :  { %v4207_v44 = vmul.f32 %v3178_v54, %v1980_v13  ;;  %v2070_v5 = vmul.f32 %v3172_v7, %v1973_v1  ;;  %v1966_v21 = vadd.f32 0.0009, %v1950_v30  ;;  %v1864_v49 = vpop.f32.mrb[69].mxu1  ;;  %v1959_v14 = vadd.f32 0.0009, %v1943_v11  ;;  %v3184_v3 = vpop.eup %3183 }
 0x25d   :  { %v2157_v41 = vsel %vm74_vm0, %v2072_v51, 0.0  ;;  %v4210_v42 = vmul.f32 %v3180_v19, %v1979_v38  ;;  %v1976_v59 = vmul.f32 %v1960_v45, %v4085_v29  ;;  %v1965_v28 = vadd.f32 0.0009, %v1949_v10  ;;  %v3186_v55 = vpop.eup %3185 }
 0x25e   :  { %v2156_v25 = vsel %vm74_vm0, %v2070_v5, 0.0  ;;  %v1982_v22 = vmul.f32 %v1966_v21, %v4125_v37  ;;  %v1975_v58 = vmul.f32 %v1959_v14, %v4087_v12  ;;  %v3188_v32 = vpop.eup %3187  ;;  %v1898_v63 = vsub.f32 %v2954_v36, %v3885_v23 }
 0x25f   :  { %v2158_v46 = vadd.f32 %v2157_v41, %v2156_v25  ;;  %v2076_v7 = vmul.f32 %v3174_v18, %v1976_v59  ;;  %v2966_v31 = vpop.f32.mrb[70].mxu1  ;;  %v1981_v29 = vmul.f32 %v1965_v28, %v4136_v39  ;;  %v1904_v62 = vsub.f32 %v2963_v2, %v3945_v53  ;;  %v3190_v37 = vpop.eup %3189 }
 0x260   :  { %v4218_v52 = vmul.f32 %v3186_v55, %v1982_v22  ;;  %v1874_v27 = vpop.f32.mrb[71].mxu1  ;;  %3197 = vrcp.f32 %v4194_v50  ;;  %v2074_v35 = vmul.f32 %v3176_v16, %v1975_v58  ;;  %v1897_v48 = vsub.f32 %v1834_v60, %v3891_v20  ;;  %v3192_v12 = vpop.eup %3191 }
 0x261   :  { %v1903_v18 = vsub.f32 %v1864_v49, %v3951_v56  ;;  %3199 = vrcp.f32 %v4197_v8  ;;  %v2086_v24 = vmul.f32 %v3188_v32, %v1981_v29  ;;  %v1946_v13 = vmul.f32 2.0, %v1898_v63  ;;  %v3194_v10 = vpop.eup %3193 }
 0x262   :  { %v1952_v1 = vmul.f32 2.0, %v1904_v62  ;;  %v2159_v39 = vsel %vm74_vm0, %v2074_v35, 0.0  ;;  %v1945_v23 = vmul.f32 2.0, %v1897_v48  ;;  %v1906_v53 = vsub.f32 %v2966_v31, %v3968_v15 }
 0x263   :  { %v1951_v30 = vmul.f32 2.0, %v1903_v18  ;;  %v2969_v43 = vpop.f32.mrb[72].mxu1  ;;  %v2161_v50 = vsel %vm74_vm0, %v2076_v7, 0.0  ;;  %v2160_v16 = vadd.f32 %v2159_v39, %v2158_v46  ;;  %v1962_v36 = vadd.f32 0.0009, %v1946_v13 }
 0x264   :  { %v1968_v20 = vadd.f32 0.0009, %v1952_v1  ;;  %v1884_v54 = vpop.f32.mrb[73].mxu1  ;;  %v1961_v56 = vadd.f32 0.0009, %v1945_v23  ;;  %v1954_v38 = vmul.f32 2.0, %v1906_v53  ;;  %v1905_v8 = vsub.f32 %v1874_v27, %v4326_v61  ;;  %v3196_v61 = vpop.eup %3195 }
 0x265   :  { %v1967_v51 = vadd.f32 0.0009, %v1951_v30  ;;  %v1978_v45 = vmul.f32 %v1962_v36, %v4096_v4  ;;  %v2162_v2 = vadd.f32 %v2161_v50, %v2160_v16  ;;  %v1908_v60 = vsub.f32 %v2969_v43, %v4342_v47 }
 0x266   :  { %v1984_v11 = vmul.f32 %v1968_v20, %v4138_v40  ;;  %v1977_v15 = vmul.f32 %v1961_v56, %v4098_v57  ;;  %v1970_v5 = vadd.f32 0.0009, %v1954_v38  ;;  %v1953_v21 = vmul.f32 2.0, %v1905_v8 }
 0x267   :  { %v1983_v19 = vmul.f32 %v1967_v51, %v4148_v33  ;;  %v2080_v49 = vmul.f32 %v3182_v9, %v1978_v45  ;;  %v1956_v59 = vmul.f32 2.0, %v1908_v60  ;;  %v1907_v14 = vsub.f32 %v1884_v54, %v4344_v6 }
 0x268   :  { %v2092_v41 = vmul.f32 %v3190_v37, %v1984_v11  ;;  %v2078_v25 = vmul.f32 %v3184_v3, %v1977_v15  ;;  %v1986_v40 = vmul.f32 %v1970_v5, %v4152_v0  ;;  %v1969_v22 = vadd.f32 0.0009, %v1953_v21 }
 0x269   :  { %v2090_v4 = vmul.f32 %v3192_v12, %v1983_v19  ;;  %v1940_v47 = vadd.f32 0.0001, %v4170_v34  ;;  %v1972_v28 = vadd.f32 0.0009, %v1956_v59  ;;  %v1955_v57 = vmul.f32 2.0, %v1907_v14 }
 0x26a   :  { %v3198_v55 = vpop.eup %3197  ;;  %v2163_v33 = vsel %vm74_vm0, %v2078_v25, 0.0  ;;  %v2096_v46 = vmul.f32 %v3194_v10, %v1986_v40  ;;  %v1985_v9 = vmul.f32 %v1969_v22, %v4160_v17  ;;  %v1939_v58 = vadd.f32 0.0001, %v4175_v26 }
 0x26b   :  { %v3200_v7 = vpop.eup %3199  ;;  %v2164_v6 = vadd.f32 %v2163_v33, %v2162_v2  ;;  %v1988_v31 = vmul.f32 %v1972_v28, %v1940_v47  ;;  %v1971_v3 = vadd.f32 0.0009, %v1955_v57  ;;  %v2165_v32 = vsel %vm74_vm0, %v2080_v49, 0.0 }
 0x26c   :  { %v2094_v0 = vmul.f32 %v3196_v61, %v1985_v9  ;;  %v2167_v62 = vsel %vm74_vm0, %v4210_v42, 0.0  ;;  %v2169_v17 = vsel %vm74_vm0, %v4207_v44, 0.0  ;;  %v2171_v26 = vsel %vm74_vm0, %v2086_v24, 0.0 }
 0x26d   :  { %v2166_v29 = vadd.f32 %v2165_v32, %v2164_v6  ;;  %v1987_v63 = vmul.f32 %v1971_v3, %v1939_v58  ;;  %v2100_v34 = vmul.f32 %v3198_v55, %v1988_v31  ;;  %v2173_v18 = vsel %vm74_vm0, %v4218_v52, 0.0 }
 0x26e   :  { %v2175_v13 = vsel %vm74_vm0, %v2090_v4, 0.0  ;;  %v2177_v39 = vsel %vm74_vm0, %v2092_v41, 0.0  ;;  %v2179_v42 = vsel %vm74_vm0, %v2094_v0, 0.0  ;;  %v2181_v53 = vsel %vm74_vm0, %v2096_v46, 0.0 }
 0x26f   :  { %v2168_v27 = vadd.f32 %v2167_v62, %v2166_v29  ;;  %v2098_v37 = vmul.f32 %v3200_v7, %v1987_v63  ;;  %v2185_v50 = vsel %vm74_vm0, %v2100_v34, 0.0 }
 0x271   :  { %v2170_v35 = vadd.f32 %v2169_v17, %v2168_v27  ;;  %v2183_v43 = vsel %vm74_vm0, %v2098_v37, 0.0 }
 0x273   :  { %v2172_v48 = vadd.f32 %v2171_v26, %v2170_v35 }
 0x275   :  { %v2174_v12 = vadd.f32 %v2173_v18, %v2172_v48 }
 0x277   :  { %v2176_v1 = vadd.f32 %v2175_v13, %v2174_v12 }
 0x279   :  { %v2178_v23 = vadd.f32 %v2177_v39, %v2176_v1 }
 0x27b   :  { %v2180_v30 = vadd.f32 %v2179_v42, %v2178_v23 }
 0x27d   :  { %v2182_v44 = vadd.f32 %v2181_v53, %v2180_v30 }
 0x27f   :  { %v2184_v24 = vadd.f32 %v2183_v43, %v2182_v44 }
 0x281   :  { %v2186_v16 = vadd.f32 %v2185_v50, %v2184_v24 }
 0x283   :  { %2187 = vadd.xlane.f32.xlu0 %v2186_v16 }
 0x310   :  { %v2188_v52 = vpop.xlane.xlu0 %2187 }
 0x311   :  { %v2189_v36 = vrot.slane %v2188_v52, 4 }
 0x313   :  { %v2190_v20 = vadd.f32 %v2189_v36, %v2188_v52 }
 0x315   :  { %v2191_v54 = vrot.slane %v2190_v20, 2 }
 0x317   :  { %v2192_v56 = vadd.f32 %v2191_v54, %v2190_v20 }
 0x319   :  { %v2193_v51 = vrot.slane %v2192_v56, 1 }
 0x31b   :  { %v2194_v38 = vadd.f32 %v2193_v51, %v2192_v56 }
 0x31d   :  { %3166 = vpush %v2194_v38 }
 0x34e   :  { %s3167_s2 = spop %3166 }
 0x34f   :  { %s2204_s29 = smul.f32 0.00048828125, %s3167_s2 }
 0x351   :  { %2206 = sst [smem:[#allocation3]] %s2204_s29 }
 0x352   :  { %3210 = shalt.err (!%p3207_p2)
}
 0x353   :  { %s3213_s11 = smov [#allocation3]  }
 0x354   :  { %2214 = dma.smem_to_hbm %s3213_s11, 16, %s4272_s4, [#allocation4]  }
 0x355   :  { %3211 = dma.done.wait [#allocation4], 16  }
 0x356   :  { %3212 = vsyncadd [#allocation4], 4294967280 }
 0x357   :  { %2218 = sfence }
 0x358   :  { %2219 = vsyncpa [#allocation4], 1 }

</bundles_post_ra>
